<compile_context>
chip_gen: v7x
topology: tpu7x:2x2x1
jax: 0.10.0
libtpu: 0.0.40
codegen_flags: <defaults>
</compile_context>

<pallas_src>
import functools
import math

import jax
import jax.numpy as jnp
from jax.experimental import pallas as pl
from jax.experimental.pallas import tpu as pltpu

# ---- small synthetic config (stands in for distilbert-base-uncased) ----
VOCAB = 64
MAX_POS = 16
HIDDEN = 32          # input_size  (model.config.hidden_size analogue)
N_HEADS = 2
HEAD_DIM = HIDDEN // N_HEADS
FFN = 64
N_LAYERS = 2
NUM_CLASSES = 4      # output_size (len(set(labels)) == 0 in the snippet; use 4)
LN_EPS = 1e-12
_REFS_PER_LAYER = 12


def _vmem():
    return pl.BlockSpec(memory_space=pltpu.MemorySpace.VMEM)


# ----------------------------- fused kernel --------------------------------

def _mm(x, w_bf16):
    # MXU matmul: bf16 operands, f32 accumulation. Weights already (K, N) bf16.
    return jnp.dot(x.astype(jnp.bfloat16), w_bf16,
                   preferred_element_type=jnp.float32)


def _layernorm(x, g, b):
    mu = jnp.mean(x, axis=-1, keepdims=True)
    var = jnp.mean(jnp.square(x - mu), axis=-1, keepdims=True)
    return (x - mu) * jax.lax.rsqrt(var + LN_EPS) * g + b


def _encoder_kernel(*refs, n_layers, n_heads, batch, seq):
    # refs layout:
    #   x (B*S, H) f32, add_mask (B, S) f32, emb_ln_g, emb_ln_b,
    #   per layer: qkv_w (H,3H) bf16, qkv_b (1,3H), o_w (H,H) bf16, o_b (1,H),
    #              sa_ln_g, sa_ln_b, ff1_w (H,F) bf16, ff1_b (1,F),
    #              ff2_w (F,H) bf16, ff2_b (1,H), out_ln_g, out_ln_b,
    #   fc_w (H,C) bf16, fc_b (1,C),
    #   out_ref (B, C) f32
    out_ref = refs[-1]
    x_ref, mask_ref, emb_g_ref, emb_b_ref = refs[0:4]
    lrefs = refs[4:4 + _REFS_PER_LAYER * n_layers]
    fc_w_ref, fc_b_ref = refs[4 + _REFS_PER_LAYER * n_layers:
                              6 + _REFS_PER_LAYER * n_layers]

    H = x_ref.shape[-1]
    Dh = H // n_heads
    M = batch * seq

    x = _layernorm(x_ref[...], emb_g_ref[...], emb_b_ref[...])

    # Additive key mask, broadcast ONCE (hoisted out of layer/head loops):
    # (B, S) -> (B, S_q, S_k); 0 where attended, -1e9 where padded.
    mask3 = jnp.broadcast_to(mask_ref[...][:, None, :], (batch, seq, seq))

    for l in range(n_layers):
        (qkv_w, qkv_b, o_w, o_b, sa_g, sa_b,
         ff1_w, ff1_b, ff2_w, ff2_b, out_g, out_b) = \
            lrefs[l * _REFS_PER_LAYER:(l + 1) * _REFS_PER_LAYER]

        residual = x
        # Single fused QKV projection; 1/sqrt(Dh) already folded into Q cols.
        qkv = _mm(x, qkv_w[...]) + qkv_b[...]          # (B*S, 3H) f32
        qkv_bf = qkv.astype(jnp.bfloat16)              # cast once per layer
        q2 = qkv_bf[:, :H]
        k2 = qkv_bf[:, H:2 * H]
        v2 = qkv_bf[:, 2 * H:3 * H]

        ow = o_w[...]                                  # (H, H) bf16, loaded once
        sa = jnp.zeros((M, H), jnp.float32)
        for h in range(n_heads):
            sl = slice(h * Dh, (h + 1) * Dh)
            qh = q2[:, sl].reshape(batch, seq, Dh)
            kh = k2[:, sl].reshape(batch, seq, Dh)
            vh = v2[:, sl].reshape(batch, seq, Dh)
            s = jnp.einsum("bqd,bkd->bqk", qh, kh,
                           preferred_element_type=jnp.float32)
            s = s + mask3                               # additive key mask, all heads
            m = jnp.max(s, axis=-1, keepdims=True)
            p = jnp.exp(s - m)
            p = p * pl.reciprocal(jnp.sum(p, axis=-1, keepdims=True), approx=True)
            ctx_h = jnp.einsum("bqk,bkd->bqd",
                               p.astype(jnp.bfloat16), vh,
                               preferred_element_type=jnp.float32)
            # Output projection as sum of per-head slabs (no concat/transpose).
            sa = sa + jnp.dot(ctx_h.reshape(M, Dh).astype(jnp.bfloat16),
                              ow[sl, :], preferred_element_type=jnp.float32)
        sa = sa + o_b[...]

        x = _layernorm(sa + residual, sa_g[...], sa_b[...])

        # TODO(synk): HF DistilBERT uses exact erf GELU; tanh approximation here.
        ff = jax.nn.gelu(_mm(x, ff1_w[...]) + ff1_b[...], approximate=True)
        ff = _mm(ff, ff2_w[...]) + ff2_b[...]
        x = _layernorm(ff + x, out_g[...], out_b[...])

    # pooled_output = last_hidden_state.mean(dim=1); logits = fc(pooled_output)
    pooled = jnp.mean(x.reshape(batch, seq, H), axis=1)        # unmasked mean
    out_ref[...] = _mm(pooled, fc_w_ref[...]) + fc_b_ref[...]


# --------------------------- params / packing ------------------------------

def init_params(key):
    def dense(k, out_d, in_d):
        return {"w": 0.02 * jax.random.normal(k, (out_d, in_d), jnp.float32),
                "b": jnp.zeros((out_d,), jnp.float32)}

    keys = jax.random.split(key, 3 + N_LAYERS)
    params = {
        "word_emb": 0.02 * jax.random.normal(keys[0], (VOCAB, HIDDEN), jnp.float32),
        "pos_emb": 0.02 * jax.random.normal(keys[1], (MAX_POS, HIDDEN), jnp.float32),
        "emb_ln_g": jnp.ones((HIDDEN,), jnp.float32),
        "emb_ln_b": jnp.zeros((HIDDEN,), jnp.float32),
        "layers": [],
    }
    for i in range(N_LAYERS):
        lk = jax.random.split(keys[2 + i], 6)
        params["layers"].append({
            "q": dense(lk[0], HIDDEN, HIDDEN),
            "k": dense(lk[1], HIDDEN, HIDDEN),
            "v": dense(lk[2], HIDDEN, HIDDEN),
            "o": dense(lk[3], HIDDEN, HIDDEN),
            "ff1": dense(lk[4], FFN, HIDDEN),
            "ff2": dense(lk[5], HIDDEN, FFN),
            "sa_ln_g": jnp.ones((HIDDEN,), jnp.float32),
            "sa_ln_b": jnp.zeros((HIDDEN,), jnp.float32),
            "out_ln_g": jnp.ones((HIDDEN,), jnp.float32),
            "out_ln_b": jnp.zeros((HIDDEN,), jnp.float32),
        })
    params["fc"] = dense(keys[-1], NUM_CLASSES, HIDDEN)
    return params


def pack_params(params):
    """Torch-layout (out, in) params -> kernel layout: transposed (in, out) bf16
    matmul weights, QKV stacked, softmax scale folded into Q, biases as (1, N) f32."""
    def wT(d):
        return d["w"].T.astype(jnp.bfloat16)

    def brow(v):
        return v.reshape(1, -1).astype(jnp.float32)

    scale = 1.0 / math.sqrt(HEAD_DIM)
    enc = [brow(params["emb_ln_g"]), brow(params["emb_ln_b"])]
    for layer in params["layers"]:
        qkv_w = jnp.concatenate(
            [layer["q"]["w"] * scale, layer["k"]["w"], layer["v"]["w"]], axis=0)
        qkv_b = jnp.concatenate(
            [layer["q"]["b"] * scale, layer["k"]["b"], layer["v"]["b"]], axis=0)
        enc += [
            qkv_w.T.astype(jnp.bfloat16), brow(qkv_b),
            wT(layer["o"]), brow(layer["o"]["b"]),
            brow(layer["sa_ln_g"]), brow(layer["sa_ln_b"]),
            wT(layer["ff1"]), brow(layer["ff1"]["b"]),
            wT(layer["ff2"]), brow(layer["ff2"]["b"]),
            brow(layer["out_ln_g"]), brow(layer["out_ln_b"]),
        ]
    enc += [wT(params["fc"]), brow(params["fc"]["b"])]
    return {"word_emb": params["word_emb"],
            "pos_emb": params["pos_emb"],
            "enc": tuple(enc)}


# ------------------------------- forward -----------------------------------

def intent_classifier_forward(packed, input_ids, attention_mask):
    B, S = input_ids.shape
    H = HIDDEN

    # Embedding gather + position add (XLA glue), then one fused Pallas kernel.
    x = jnp.take(packed["word_emb"], input_ids, axis=0) + packed["pos_emb"][:S][None]
    x = x.reshape(B * S, H).astype(jnp.float32)

    # Additive attention mask: 0 where attended, -1e9 where padded.
    add_mask = (attention_mask.astype(jnp.float32) - 1.0) * 1e9

    n_in = 2 + len(packed["enc"])
    kernel = pl.pallas_call(
        functools.partial(_encoder_kernel, n_layers=N_LAYERS, n_heads=N_HEADS,
                          batch=B, seq=S),
        out_shape=jax.ShapeDtypeStruct((B, NUM_CLASSES), jnp.float32),
        in_specs=[_vmem()] * n_in,
        out_specs=_vmem(),
    )
    return kernel(x, add_mask, *packed["enc"])


if __name__ == "__main__":
    key = jax.random.PRNGKey(0)
    pkey, ikey = jax.random.split(key)
    params = init_params(pkey)
    packed = pack_params(params)

    B, S = 2, 8
    input_ids = jax.random.randint(ikey, (B, S), 0, VOCAB, dtype=jnp.int32)
    attention_mask = jnp.ones((B, S), dtype=jnp.int32).at[1, 6:].set(0)

    logits = jax.jit(intent_classifier_forward)(packed, input_ids, attention_mask)
    jax.block_until_ready(logits)
    assert logits.shape == (B, NUM_CLASSES) and logits.dtype == jnp.float32
    print("KERNEL_OK")
</pallas_src>

<mosaic_0001>
module attributes {stable_mosaic.version = 11 : i64} {
  func.func @_encoder_kernel(%arg0: memref<16x32xf32, #tpu.memory_space<vmem>>, %arg1: memref<2x8xf32, #tpu.memory_space<vmem>>, %arg2: memref<1x32xf32, #tpu.memory_space<vmem>>, %arg3: memref<1x32xf32, #tpu.memory_space<vmem>>, %arg4: memref<32x96xbf16, #tpu.memory_space<vmem>>, %arg5: memref<1x96xf32, #tpu.memory_space<vmem>>, %arg6: memref<32x32xbf16, #tpu.memory_space<vmem>>, %arg7: memref<1x32xf32, #tpu.memory_space<vmem>>, %arg8: memref<1x32xf32, #tpu.memory_space<vmem>>, %arg9: memref<1x32xf32, #tpu.memory_space<vmem>>, %arg10: memref<32x64xbf16, #tpu.memory_space<vmem>>, %arg11: memref<1x64xf32, #tpu.memory_space<vmem>>, %arg12: memref<64x32xbf16, #tpu.memory_space<vmem>>, %arg13: memref<1x32xf32, #tpu.memory_space<vmem>>, %arg14: memref<1x32xf32, #tpu.memory_space<vmem>>, %arg15: memref<1x32xf32, #tpu.memory_space<vmem>>, %arg16: memref<32x96xbf16, #tpu.memory_space<vmem>>, %arg17: memref<1x96xf32, #tpu.memory_space<vmem>>, %arg18: memref<32x32xbf16, #tpu.memory_space<vmem>>, %arg19: memref<1x32xf32, #tpu.memory_space<vmem>>, %arg20: memref<1x32xf32, #tpu.memory_space<vmem>>, %arg21: memref<1x32xf32, #tpu.memory_space<vmem>>, %arg22: memref<32x64xbf16, #tpu.memory_space<vmem>>, %arg23: memref<1x64xf32, #tpu.memory_space<vmem>>, %arg24: memref<64x32xbf16, #tpu.memory_space<vmem>>, %arg25: memref<1x32xf32, #tpu.memory_space<vmem>>, %arg26: memref<1x32xf32, #tpu.memory_space<vmem>>, %arg27: memref<1x32xf32, #tpu.memory_space<vmem>>, %arg28: memref<32x4xbf16, #tpu.memory_space<vmem>>, %arg29: memref<1x4xf32, #tpu.memory_space<vmem>>, %arg30: memref<2x4xf32, #tpu.memory_space<vmem>>) attributes {dimension_semantics = [], scalar_prefetch = 0 : i64, scratch_operands = 0 : i64, tpu.core_type = #tpu.core_type<tc>} {
    %c0 = arith.constant 0 : index
    %c0_0 = arith.constant 0 : index
    %0 = vector.load %arg0[%c0, %c0_0] : memref<16x32xf32, #tpu.memory_space<vmem>>, vector<16x32xf32>
    %c0_1 = arith.constant 0 : index
    %c0_2 = arith.constant 0 : index
    %1 = vector.load %arg2[%c0_1, %c0_2] : memref<1x32xf32, #tpu.memory_space<vmem>>, vector<1x32xf32>
    %c0_3 = arith.constant 0 : index
    %c0_4 = arith.constant 0 : index
    %2 = vector.load %arg3[%c0_3, %c0_4] : memref<1x32xf32, #tpu.memory_space<vmem>>, vector<1x32xf32>
    %cst = arith.constant dense<0.000000e+00> : vector<16xf32>
    %3 = vector.multi_reduction <add>, %0, %cst [1] : vector<16x32xf32> to vector<16xf32>
    %4 = vector.shape_cast %3 : vector<16xf32> to vector<16x1xf32>
    %cst_5 = arith.constant 3.200000e+01 : f32
    %5 = vector.broadcast %cst_5 : f32 to vector<16x1xf32>
    %6 = arith.divf %4, %5 : vector<16x1xf32>
    %7 = vector.broadcast %6 : vector<16x1xf32> to vector<16x32xf32>
    %8 = arith.subf %0, %7 : vector<16x32xf32>
    %9 = arith.mulf %8, %8 : vector<16x32xf32>
    %cst_6 = arith.constant dense<0.000000e+00> : vector<16xf32>
    %10 = vector.multi_reduction <add>, %9, %cst_6 [1] : vector<16x32xf32> to vector<16xf32>
    %11 = vector.shape_cast %10 : vector<16xf32> to vector<16x1xf32>
    %cst_7 = arith.constant 3.200000e+01 : f32
    %12 = vector.broadcast %cst_7 : f32 to vector<16x1xf32>
    %13 = arith.divf %11, %12 : vector<16x1xf32>
    %14 = vector.broadcast %6 : vector<16x1xf32> to vector<16x32xf32>
    %15 = arith.subf %0, %14 : vector<16x32xf32>
    %cst_8 = arith.constant 9.99999996E-13 : f32
    %16 = vector.broadcast %cst_8 : f32 to vector<16x1xf32>
    %17 = arith.addf %13, %16 : vector<16x1xf32>
    %18 = math.rsqrt %17 : vector<16x1xf32>
    %19 = vector.broadcast %18 : vector<16x1xf32> to vector<16x32xf32>
    %20 = arith.mulf %15, %19 : vector<16x32xf32>
    %21 = vector.broadcast %1 : vector<1x32xf32> to vector<16x32xf32>
    %22 = arith.mulf %20, %21 : vector<16x32xf32>
    %23 = vector.broadcast %2 : vector<1x32xf32> to vector<16x32xf32>
    %24 = arith.addf %22, %23 : vector<16x32xf32>
    %c0_9 = arith.constant 0 : index
    %c0_10 = arith.constant 0 : index
    %25 = vector.load %arg1[%c0_9, %c0_10] : memref<2x8xf32, #tpu.memory_space<vmem>>, vector<2x8xf32>
    %26 = vector.shape_cast %25 : vector<2x8xf32> to vector<2x1x8xf32>
    %27 = vector.shape_cast %26 : vector<2x1x8xf32> to vector<2x1x8xf32>
    %28 = vector.broadcast %27 : vector<2x1x8xf32> to vector<2x8x8xf32>
    %c0_11 = arith.constant 0 : index
    %c0_12 = arith.constant 0 : index
    %29 = vector.load %arg4[%c0_11, %c0_12] : memref<32x96xbf16, #tpu.memory_space<vmem>>, vector<32x96xbf16>
    %30 = arith.truncf %24 : vector<16x32xf32> to vector<16x32xbf16>
    %cst_13 = arith.constant dense<0.000000e+00> : vector<16x96xf32>
    %31 = tpu.matmul %30, %29, %cst_13 {dimension_numbers = #tpu.dot_dimension_numbers<[1], [0], [0], [1], [0, 0, 1, 1], [], []>} : vector<16x32xbf16>, vector<32x96xbf16>, vector<16x96xf32> -> vector<16x96xf32>
    %c0_14 = arith.constant 0 : index
    %c0_15 = arith.constant 0 : index
    %32 = vector.load %arg5[%c0_14, %c0_15] : memref<1x96xf32, #tpu.memory_space<vmem>>, vector<1x96xf32>
    %33 = vector.broadcast %32 : vector<1x96xf32> to vector<16x96xf32>
    %34 = arith.addf %31, %33 : vector<16x96xf32>
    %35 = arith.truncf %34 : vector<16x96xf32> to vector<16x96xbf16>
    %36 = vector.extract_strided_slice %35 {offsets = [0, 0], sizes = [16, 32], strides = [1, 1]} : vector<16x96xbf16> to vector<16x32xbf16>
    %37 = vector.extract_strided_slice %35 {offsets = [0, 32], sizes = [16, 32], strides = [1, 1]} : vector<16x96xbf16> to vector<16x32xbf16>
    %38 = vector.extract_strided_slice %35 {offsets = [0, 64], sizes = [16, 32], strides = [1, 1]} : vector<16x96xbf16> to vector<16x32xbf16>
    %c0_16 = arith.constant 0 : index
    %c0_17 = arith.constant 0 : index
    %39 = vector.load %arg6[%c0_16, %c0_17] : memref<32x32xbf16, #tpu.memory_space<vmem>>, vector<32x32xbf16>
    %cst_18 = arith.constant 0.000000e+00 : f32
    %40 = vector.broadcast %cst_18 : f32 to vector<16x32xf32>
    %41 = vector.extract_strided_slice %36 {offsets = [0, 0], sizes = [16, 16], strides = [1, 1]} : vector<16x32xbf16> to vector<16x16xbf16>
    %42 = vector.shape_cast %41 : vector<16x16xbf16> to vector<2x8x16xbf16>
    %43 = vector.extract_strided_slice %37 {offsets = [0, 0], sizes = [16, 16], strides = [1, 1]} : vector<16x32xbf16> to vector<16x16xbf16>
    %44 = vector.shape_cast %43 : vector<16x16xbf16> to vector<2x8x16xbf16>
    %45 = vector.extract_strided_slice %38 {offsets = [0, 0], sizes = [16, 16], strides = [1, 1]} : vector<16x32xbf16> to vector<16x16xbf16>
    %46 = vector.shape_cast %45 : vector<16x16xbf16> to vector<2x8x16xbf16>
    "tpu.trace_start"() <{level = 10 : i32, message = "bqd,bkd->bqk"}> : () -> ()
    %cst_19 = arith.constant dense<0.000000e+00> : vector<2x8x8xf32>
    %47 = tpu.matmul %42, %44, %cst_19 {dimension_numbers = #tpu.dot_dimension_numbers<[2], [2], [1], [1], [0, 0, 0, 1, 1, 1], [0], [0]>} : vector<2x8x16xbf16>, vector<2x8x16xbf16>, vector<2x8x8xf32> -> vector<2x8x8xf32>
    "tpu.trace_stop"() : () -> ()
    %48 = arith.addf %47, %28 : vector<2x8x8xf32>
    %cst_20 = arith.constant dense<0xFF800000> : vector<2x8xf32>
    %49 = vector.multi_reduction <maximumf>, %48, %cst_20 [2] : vector<2x8x8xf32> to vector<2x8xf32>
    %50 = vector.shape_cast %49 : vector<2x8xf32> to vector<2x8x1xf32>
    %51 = vector.broadcast %50 : vector<2x8x1xf32> to vector<2x8x8xf32>
    %52 = arith.subf %48, %51 : vector<2x8x8xf32>
    %53 = math.exp %52 : vector<2x8x8xf32>
    %cst_21 = arith.constant dense<0.000000e+00> : vector<2x8xf32>
    %54 = vector.multi_reduction <add>, %53, %cst_21 [2] : vector<2x8x8xf32> to vector<2x8xf32>
    %55 = vector.shape_cast %54 : vector<2x8xf32> to vector<2x8x1xf32>
    %56 = tpu.reciprocal %55 {approx = true} : vector<2x8x1xf32> -> vector<2x8x1xf32>
    %57 = vector.broadcast %56 : vector<2x8x1xf32> to vector<2x8x8xf32>
    %58 = arith.mulf %53, %57 : vector<2x8x8xf32>
    %59 = arith.truncf %58 : vector<2x8x8xf32> to vector<2x8x8xbf16>
    "tpu.trace_start"() <{level = 10 : i32, message = "bqk,bkd->bqd"}> : () -> ()
    %cst_22 = arith.constant dense<0.000000e+00> : vector<2x8x16xf32>
    %60 = tpu.matmul %59, %46, %cst_22 {dimension_numbers = #tpu.dot_dimension_numbers<[2], [1], [1], [2], [0, 0, 0, 1, 1, 2], [0], [0]>} : vector<2x8x8xbf16>, vector<2x8x16xbf16>, vector<2x8x16xf32> -> vector<2x8x16xf32>
    "tpu.trace_stop"() : () -> ()
    %61 = vector.shape_cast %60 : vector<2x8x16xf32> to vector<16x16xf32>
    %62 = arith.truncf %61 : vector<16x16xf32> to vector<16x16xbf16>
    %63 = vector.extract_strided_slice %39 {offsets = [0, 0], sizes = [16, 32], strides = [1, 1]} : vector<32x32xbf16> to vector<16x32xbf16>
    %cst_23 = arith.constant dense<0.000000e+00> : vector<16x32xf32>
    %64 = tpu.matmul %62, %63, %cst_23 {dimension_numbers = #tpu.dot_dimension_numbers<[1], [0], [0], [1], [0, 0, 1, 1], [], []>} : vector<16x16xbf16>, vector<16x32xbf16>, vector<16x32xf32> -> vector<16x32xf32>
    %65 = arith.addf %40, %64 : vector<16x32xf32>
    %66 = vector.extract_strided_slice %36 {offsets = [0, 16], sizes = [16, 16], strides = [1, 1]} : vector<16x32xbf16> to vector<16x16xbf16>
    %67 = vector.shape_cast %66 : vector<16x16xbf16> to vector<2x8x16xbf16>
    %68 = vector.extract_strided_slice %37 {offsets = [0, 16], sizes = [16, 16], strides = [1, 1]} : vector<16x32xbf16> to vector<16x16xbf16>
    %69 = vector.shape_cast %68 : vector<16x16xbf16> to vector<2x8x16xbf16>
    %70 = vector.extract_strided_slice %38 {offsets = [0, 16], sizes = [16, 16], strides = [1, 1]} : vector<16x32xbf16> to vector<16x16xbf16>
    %71 = vector.shape_cast %70 : vector<16x16xbf16> to vector<2x8x16xbf16>
    "tpu.trace_start"() <{level = 10 : i32, message = "bqd,bkd->bqk"}> : () -> ()
    %cst_24 = arith.constant dense<0.000000e+00> : vector<2x8x8xf32>
    %72 = tpu.matmul %67, %69, %cst_24 {dimension_numbers = #tpu.dot_dimension_numbers<[2], [2], [1], [1], [0, 0, 0, 1, 1, 1], [0], [0]>} : vector<2x8x16xbf16>, vector<2x8x16xbf16>, vector<2x8x8xf32> -> vector<2x8x8xf32>
    "tpu.trace_stop"() : () -> ()
    %73 = arith.addf %72, %28 : vector<2x8x8xf32>
    %cst_25 = arith.constant dense<0xFF800000> : vector<2x8xf32>
    %74 = vector.multi_reduction <maximumf>, %73, %cst_25 [2] : vector<2x8x8xf32> to vector<2x8xf32>
    %75 = vector.shape_cast %74 : vector<2x8xf32> to vector<2x8x1xf32>
    %76 = vector.broadcast %75 : vector<2x8x1xf32> to vector<2x8x8xf32>
    %77 = arith.subf %73, %76 : vector<2x8x8xf32>
    %78 = math.exp %77 : vector<2x8x8xf32>
    %cst_26 = arith.constant dense<0.000000e+00> : vector<2x8xf32>
    %79 = vector.multi_reduction <add>, %78, %cst_26 [2] : vector<2x8x8xf32> to vector<2x8xf32>
    %80 = vector.shape_cast %79 : vector<2x8xf32> to vector<2x8x1xf32>
    %81 = tpu.reciprocal %80 {approx = true} : vector<2x8x1xf32> -> vector<2x8x1xf32>
    %82 = vector.broadcast %81 : vector<2x8x1xf32> to vector<2x8x8xf32>
    %83 = arith.mulf %78, %82 : vector<2x8x8xf32>
    %84 = arith.truncf %83 : vector<2x8x8xf32> to vector<2x8x8xbf16>
    "tpu.trace_start"() <{level = 10 : i32, message = "bqk,bkd->bqd"}> : () -> ()
    %cst_27 = arith.constant dense<0.000000e+00> : vector<2x8x16xf32>
    %85 = tpu.matmul %84, %71, %cst_27 {dimension_numbers = #tpu.dot_dimension_numbers<[2], [1], [1], [2], [0, 0, 0, 1, 1, 2], [0], [0]>} : vector<2x8x8xbf16>, vector<2x8x16xbf16>, vector<2x8x16xf32> -> vector<2x8x16xf32>
    "tpu.trace_stop"() : () -> ()
    %86 = vector.shape_cast %85 : vector<2x8x16xf32> to vector<16x16xf32>
    %87 = arith.truncf %86 : vector<16x16xf32> to vector<16x16xbf16>
    %88 = vector.extract_strided_slice %39 {offsets = [16, 0], sizes = [16, 32], strides = [1, 1]} : vector<32x32xbf16> to vector<16x32xbf16>
    %cst_28 = arith.constant dense<0.000000e+00> : vector<16x32xf32>
    %89 = tpu.matmul %87, %88, %cst_28 {dimension_numbers = #tpu.dot_dimension_numbers<[1], [0], [0], [1], [0, 0, 1, 1], [], []>} : vector<16x16xbf16>, vector<16x32xbf16>, vector<16x32xf32> -> vector<16x32xf32>
    %90 = arith.addf %65, %89 : vector<16x32xf32>
    %c0_29 = arith.constant 0 : index
    %c0_30 = arith.constant 0 : index
    %91 = vector.load %arg7[%c0_29, %c0_30] : memref<1x32xf32, #tpu.memory_space<vmem>>, vector<1x32xf32>
    %92 = vector.broadcast %91 : vector<1x32xf32> to vector<16x32xf32>
    %93 = arith.addf %90, %92 : vector<16x32xf32>
    %94 = arith.addf %93, %24 : vector<16x32xf32>
    %c0_31 = arith.constant 0 : index
    %c0_32 = arith.constant 0 : index
    %95 = vector.load %arg8[%c0_31, %c0_32] : memref<1x32xf32, #tpu.memory_space<vmem>>, vector<1x32xf32>
    %c0_33 = arith.constant 0 : index
    %c0_34 = arith.constant 0 : index
    %96 = vector.load %arg9[%c0_33, %c0_34] : memref<1x32xf32, #tpu.memory_space<vmem>>, vector<1x32xf32>
    %cst_35 = arith.constant dense<0.000000e+00> : vector<16xf32>
    %97 = vector.multi_reduction <add>, %94, %cst_35 [1] : vector<16x32xf32> to vector<16xf32>
    %98 = vector.shape_cast %97 : vector<16xf32> to vector<16x1xf32>
    %cst_36 = arith.constant 3.200000e+01 : f32
    %99 = vector.broadcast %cst_36 : f32 to vector<16x1xf32>
    %100 = arith.divf %98, %99 : vector<16x1xf32>
    %101 = vector.broadcast %100 : vector<16x1xf32> to vector<16x32xf32>
    %102 = arith.subf %94, %101 : vector<16x32xf32>
    %103 = arith.mulf %102, %102 : vector<16x32xf32>
    %cst_37 = arith.constant dense<0.000000e+00> : vector<16xf32>
    %104 = vector.multi_reduction <add>, %103, %cst_37 [1] : vector<16x32xf32> to vector<16xf32>
    %105 = vector.shape_cast %104 : vector<16xf32> to vector<16x1xf32>
    %cst_38 = arith.constant 3.200000e+01 : f32
    %106 = vector.broadcast %cst_38 : f32 to vector<16x1xf32>
    %107 = arith.divf %105, %106 : vector<16x1xf32>
    %108 = vector.broadcast %100 : vector<16x1xf32> to vector<16x32xf32>
    %109 = arith.subf %94, %108 : vector<16x32xf32>
    %cst_39 = arith.constant 9.99999996E-13 : f32
    %110 = vector.broadcast %cst_39 : f32 to vector<16x1xf32>
    %111 = arith.addf %107, %110 : vector<16x1xf32>
    %112 = math.rsqrt %111 : vector<16x1xf32>
    %113 = vector.broadcast %112 : vector<16x1xf32> to vector<16x32xf32>
    %114 = arith.mulf %109, %113 : vector<16x32xf32>
    %115 = vector.broadcast %95 : vector<1x32xf32> to vector<16x32xf32>
    %116 = arith.mulf %114, %115 : vector<16x32xf32>
    %117 = vector.broadcast %96 : vector<1x32xf32> to vector<16x32xf32>
    %118 = arith.addf %116, %117 : vector<16x32xf32>
    %c0_40 = arith.constant 0 : index
    %c0_41 = arith.constant 0 : index
    %119 = vector.load %arg10[%c0_40, %c0_41] : memref<32x64xbf16, #tpu.memory_space<vmem>>, vector<32x64xbf16>
    %120 = arith.truncf %118 : vector<16x32xf32> to vector<16x32xbf16>
    %cst_42 = arith.constant dense<0.000000e+00> : vector<16x64xf32>
    %121 = tpu.matmul %120, %119, %cst_42 {dimension_numbers = #tpu.dot_dimension_numbers<[1], [0], [0], [1], [0, 0, 1, 1], [], []>} : vector<16x32xbf16>, vector<32x64xbf16>, vector<16x64xf32> -> vector<16x64xf32>
    %c0_43 = arith.constant 0 : index
    %c0_44 = arith.constant 0 : index
    %122 = vector.load %arg11[%c0_43, %c0_44] : memref<1x64xf32, #tpu.memory_space<vmem>>, vector<1x64xf32>
    %123 = vector.broadcast %122 : vector<1x64xf32> to vector<16x64xf32>
    %124 = arith.addf %121, %123 : vector<16x64xf32>
    %125 = arith.mulf %124, %124 : vector<16x64xf32>
    %126 = arith.mulf %124, %125 : vector<16x64xf32>
    %cst_45 = arith.constant 4.471500e-02 : f32
    %127 = vector.broadcast %cst_45 : f32 to vector<16x64xf32>
    %128 = arith.mulf %127, %126 : vector<16x64xf32>
    %129 = arith.addf %124, %128 : vector<16x64xf32>
    %cst_46 = arith.constant 0.797884583 : f32
    %130 = vector.broadcast %cst_46 : f32 to vector<16x64xf32>
    %131 = arith.mulf %130, %129 : vector<16x64xf32>
    %132 = math.tanh %131 : vector<16x64xf32>
    %cst_47 = arith.constant 1.000000e+00 : f32
    %133 = vector.broadcast %cst_47 : f32 to vector<16x64xf32>
    %134 = arith.addf %133, %132 : vector<16x64xf32>
    %cst_48 = arith.constant 5.000000e-01 : f32
    %135 = vector.broadcast %cst_48 : f32 to vector<16x64xf32>
    %136 = arith.mulf %135, %134 : vector<16x64xf32>
    %137 = arith.mulf %124, %136 : vector<16x64xf32>
    %c0_49 = arith.constant 0 : index
    %c0_50 = arith.constant 0 : index
    %138 = vector.load %arg12[%c0_49, %c0_50] : memref<64x32xbf16, #tpu.memory_space<vmem>>, vector<64x32xbf16>
    %139 = arith.truncf %137 : vector<16x64xf32> to vector<16x64xbf16>
    %cst_51 = arith.constant dense<0.000000e+00> : vector<16x32xf32>
    %140 = tpu.matmul %139, %138, %cst_51 {dimension_numbers = #tpu.dot_dimension_numbers<[1], [0], [0], [1], [0, 0, 1, 1], [], []>} : vector<16x64xbf16>, vector<64x32xbf16>, vector<16x32xf32> -> vector<16x32xf32>
    %c0_52 = arith.constant 0 : index
    %c0_53 = arith.constant 0 : index
    %141 = vector.load %arg13[%c0_52, %c0_53] : memref<1x32xf32, #tpu.memory_space<vmem>>, vector<1x32xf32>
    %142 = vector.broadcast %141 : vector<1x32xf32> to vector<16x32xf32>
    %143 = arith.addf %140, %142 : vector<16x32xf32>
    %144 = arith.addf %143, %118 : vector<16x32xf32>
    %c0_54 = arith.constant 0 : index
    %c0_55 = arith.constant 0 : index
    %145 = vector.load %arg14[%c0_54, %c0_55] : memref<1x32xf32, #tpu.memory_space<vmem>>, vector<1x32xf32>
    %c0_56 = arith.constant 0 : index
    %c0_57 = arith.constant 0 : index
    %146 = vector.load %arg15[%c0_56, %c0_57] : memref<1x32xf32, #tpu.memory_space<vmem>>, vector<1x32xf32>
    %cst_58 = arith.constant dense<0.000000e+00> : vector<16xf32>
    %147 = vector.multi_reduction <add>, %144, %cst_58 [1] : vector<16x32xf32> to vector<16xf32>
    %148 = vector.shape_cast %147 : vector<16xf32> to vector<16x1xf32>
    %cst_59 = arith.constant 3.200000e+01 : f32
    %149 = vector.broadcast %cst_59 : f32 to vector<16x1xf32>
    %150 = arith.divf %148, %149 : vector<16x1xf32>
    %151 = vector.broadcast %150 : vector<16x1xf32> to vector<16x32xf32>
    %152 = arith.subf %144, %151 : vector<16x32xf32>
    %153 = arith.mulf %152, %152 : vector<16x32xf32>
    %cst_60 = arith.constant dense<0.000000e+00> : vector<16xf32>
    %154 = vector.multi_reduction <add>, %153, %cst_60 [1] : vector<16x32xf32> to vector<16xf32>
    %155 = vector.shape_cast %154 : vector<16xf32> to vector<16x1xf32>
    %cst_61 = arith.constant 3.200000e+01 : f32
    %156 = vector.broadcast %cst_61 : f32 to vector<16x1xf32>
    %157 = arith.divf %155, %156 : vector<16x1xf32>
    %158 = vector.broadcast %150 : vector<16x1xf32> to vector<16x32xf32>
    %159 = arith.subf %144, %158 : vector<16x32xf32>
    %cst_62 = arith.constant 9.99999996E-13 : f32
    %160 = vector.broadcast %cst_62 : f32 to vector<16x1xf32>
    %161 = arith.addf %157, %160 : vector<16x1xf32>
    %162 = math.rsqrt %161 : vector<16x1xf32>
    %163 = vector.broadcast %162 : vector<16x1xf32> to vector<16x32xf32>
    %164 = arith.mulf %159, %163 : vector<16x32xf32>
    %165 = vector.broadcast %145 : vector<1x32xf32> to vector<16x32xf32>
    %166 = arith.mulf %164, %165 : vector<16x32xf32>
    %167 = vector.broadcast %146 : vector<1x32xf32> to vector<16x32xf32>
    %168 = arith.addf %166, %167 : vector<16x32xf32>
    %c0_63 = arith.constant 0 : index
    %c0_64 = arith.constant 0 : index
    %169 = vector.load %arg16[%c0_63, %c0_64] : memref<32x96xbf16, #tpu.memory_space<vmem>>, vector<32x96xbf16>
    %170 = arith.truncf %168 : vector<16x32xf32> to vector<16x32xbf16>
    %cst_65 = arith.constant dense<0.000000e+00> : vector<16x96xf32>
    %171 = tpu.matmul %170, %169, %cst_65 {dimension_numbers = #tpu.dot_dimension_numbers<[1], [0], [0], [1], [0, 0, 1, 1], [], []>} : vector<16x32xbf16>, vector<32x96xbf16>, vector<16x96xf32> -> vector<16x96xf32>
    %c0_66 = arith.constant 0 : index
    %c0_67 = arith.constant 0 : index
    %172 = vector.load %arg17[%c0_66, %c0_67] : memref<1x96xf32, #tpu.memory_space<vmem>>, vector<1x96xf32>
    %173 = vector.broadcast %172 : vector<1x96xf32> to vector<16x96xf32>
    %174 = arith.addf %171, %173 : vector<16x96xf32>
    %175 = arith.truncf %174 : vector<16x96xf32> to vector<16x96xbf16>
    %176 = vector.extract_strided_slice %175 {offsets = [0, 0], sizes = [16, 32], strides = [1, 1]} : vector<16x96xbf16> to vector<16x32xbf16>
    %177 = vector.extract_strided_slice %175 {offsets = [0, 32], sizes = [16, 32], strides = [1, 1]} : vector<16x96xbf16> to vector<16x32xbf16>
    %178 = vector.extract_strided_slice %175 {offsets = [0, 64], sizes = [16, 32], strides = [1, 1]} : vector<16x96xbf16> to vector<16x32xbf16>
    %c0_68 = arith.constant 0 : index
    %c0_69 = arith.constant 0 : index
    %179 = vector.load %arg18[%c0_68, %c0_69] : memref<32x32xbf16, #tpu.memory_space<vmem>>, vector<32x32xbf16>
    %cst_70 = arith.constant 0.000000e+00 : f32
    %180 = vector.broadcast %cst_70 : f32 to vector<16x32xf32>
    %181 = vector.extract_strided_slice %176 {offsets = [0, 0], sizes = [16, 16], strides = [1, 1]} : vector<16x32xbf16> to vector<16x16xbf16>
    %182 = vector.shape_cast %181 : vector<16x16xbf16> to vector<2x8x16xbf16>
    %183 = vector.extract_strided_slice %177 {offsets = [0, 0], sizes = [16, 16], strides = [1, 1]} : vector<16x32xbf16> to vector<16x16xbf16>
    %184 = vector.shape_cast %183 : vector<16x16xbf16> to vector<2x8x16xbf16>
    %185 = vector.extract_strided_slice %178 {offsets = [0, 0], sizes = [16, 16], strides = [1, 1]} : vector<16x32xbf16> to vector<16x16xbf16>
    %186 = vector.shape_cast %185 : vector<16x16xbf16> to vector<2x8x16xbf16>
    "tpu.trace_start"() <{level = 10 : i32, message = "bqd,bkd->bqk"}> : () -> ()
    %cst_71 = arith.constant dense<0.000000e+00> : vector<2x8x8xf32>
    %187 = tpu.matmul %182, %184, %cst_71 {dimension_numbers = #tpu.dot_dimension_numbers<[2], [2], [1], [1], [0, 0, 0, 1, 1, 1], [0], [0]>} : vector<2x8x16xbf16>, vector<2x8x16xbf16>, vector<2x8x8xf32> -> vector<2x8x8xf32>
    "tpu.trace_stop"() : () -> ()
    %188 = arith.addf %187, %28 : vector<2x8x8xf32>
    %cst_72 = arith.constant dense<0xFF800000> : vector<2x8xf32>
    %189 = vector.multi_reduction <maximumf>, %188, %cst_72 [2] : vector<2x8x8xf32> to vector<2x8xf32>
    %190 = vector.shape_cast %189 : vector<2x8xf32> to vector<2x8x1xf32>
    %191 = vector.broadcast %190 : vector<2x8x1xf32> to vector<2x8x8xf32>
    %192 = arith.subf %188, %191 : vector<2x8x8xf32>
    %193 = math.exp %192 : vector<2x8x8xf32>
    %cst_73 = arith.constant dense<0.000000e+00> : vector<2x8xf32>
    %194 = vector.multi_reduction <add>, %193, %cst_73 [2] : vector<2x8x8xf32> to vector<2x8xf32>
    %195 = vector.shape_cast %194 : vector<2x8xf32> to vector<2x8x1xf32>
    %196 = tpu.reciprocal %195 {approx = true} : vector<2x8x1xf32> -> vector<2x8x1xf32>
    %197 = vector.broadcast %196 : vector<2x8x1xf32> to vector<2x8x8xf32>
    %198 = arith.mulf %193, %197 : vector<2x8x8xf32>
    %199 = arith.truncf %198 : vector<2x8x8xf32> to vector<2x8x8xbf16>
    "tpu.trace_start"() <{level = 10 : i32, message = "bqk,bkd->bqd"}> : () -> ()
    %cst_74 = arith.constant dense<0.000000e+00> : vector<2x8x16xf32>
    %200 = tpu.matmul %199, %186, %cst_74 {dimension_numbers = #tpu.dot_dimension_numbers<[2], [1], [1], [2], [0, 0, 0, 1, 1, 2], [0], [0]>} : vector<2x8x8xbf16>, vector<2x8x16xbf16>, vector<2x8x16xf32> -> vector<2x8x16xf32>
    "tpu.trace_stop"() : () -> ()
    %201 = vector.shape_cast %200 : vector<2x8x16xf32> to vector<16x16xf32>
    %202 = arith.truncf %201 : vector<16x16xf32> to vector<16x16xbf16>
    %203 = vector.extract_strided_slice %179 {offsets = [0, 0], sizes = [16, 32], strides = [1, 1]} : vector<32x32xbf16> to vector<16x32xbf16>
    %cst_75 = arith.constant dense<0.000000e+00> : vector<16x32xf32>
    %204 = tpu.matmul %202, %203, %cst_75 {dimension_numbers = #tpu.dot_dimension_numbers<[1], [0], [0], [1], [0, 0, 1, 1], [], []>} : vector<16x16xbf16>, vector<16x32xbf16>, vector<16x32xf32> -> vector<16x32xf32>
    %205 = arith.addf %180, %204 : vector<16x32xf32>
    %206 = vector.extract_strided_slice %176 {offsets = [0, 16], sizes = [16, 16], strides = [1, 1]} : vector<16x32xbf16> to vector<16x16xbf16>
    %207 = vector.shape_cast %206 : vector<16x16xbf16> to vector<2x8x16xbf16>
    %208 = vector.extract_strided_slice %177 {offsets = [0, 16], sizes = [16, 16], strides = [1, 1]} : vector<16x32xbf16> to vector<16x16xbf16>
    %209 = vector.shape_cast %208 : vector<16x16xbf16> to vector<2x8x16xbf16>
    %210 = vector.extract_strided_slice %178 {offsets = [0, 16], sizes = [16, 16], strides = [1, 1]} : vector<16x32xbf16> to vector<16x16xbf16>
    %211 = vector.shape_cast %210 : vector<16x16xbf16> to vector<2x8x16xbf16>
    "tpu.trace_start"() <{level = 10 : i32, message = "bqd,bkd->bqk"}> : () -> ()
    %cst_76 = arith.constant dense<0.000000e+00> : vector<2x8x8xf32>
    %212 = tpu.matmul %207, %209, %cst_76 {dimension_numbers = #tpu.dot_dimension_numbers<[2], [2], [1], [1], [0, 0, 0, 1, 1, 1], [0], [0]>} : vector<2x8x16xbf16>, vector<2x8x16xbf16>, vector<2x8x8xf32> -> vector<2x8x8xf32>
    "tpu.trace_stop"() : () -> ()
    %213 = arith.addf %212, %28 : vector<2x8x8xf32>
    %cst_77 = arith.constant dense<0xFF800000> : vector<2x8xf32>
    %214 = vector.multi_reduction <maximumf>, %213, %cst_77 [2] : vector<2x8x8xf32> to vector<2x8xf32>
    %215 = vector.shape_cast %214 : vector<2x8xf32> to vector<2x8x1xf32>
    %216 = vector.broadcast %215 : vector<2x8x1xf32> to vector<2x8x8xf32>
    %217 = arith.subf %213, %216 : vector<2x8x8xf32>
    %218 = math.exp %217 : vector<2x8x8xf32>
    %cst_78 = arith.constant dense<0.000000e+00> : vector<2x8xf32>
    %219 = vector.multi_reduction <add>, %218, %cst_78 [2] : vector<2x8x8xf32> to vector<2x8xf32>
    %220 = vector.shape_cast %219 : vector<2x8xf32> to vector<2x8x1xf32>
    %221 = tpu.reciprocal %220 {approx = true} : vector<2x8x1xf32> -> vector<2x8x1xf32>
    %222 = vector.broadcast %221 : vector<2x8x1xf32> to vector<2x8x8xf32>
    %223 = arith.mulf %218, %222 : vector<2x8x8xf32>
    %224 = arith.truncf %223 : vector<2x8x8xf32> to vector<2x8x8xbf16>
    "tpu.trace_start"() <{level = 10 : i32, message = "bqk,bkd->bqd"}> : () -> ()
    %cst_79 = arith.constant dense<0.000000e+00> : vector<2x8x16xf32>
    %225 = tpu.matmul %224, %211, %cst_79 {dimension_numbers = #tpu.dot_dimension_numbers<[2], [1], [1], [2], [0, 0, 0, 1, 1, 2], [0], [0]>} : vector<2x8x8xbf16>, vector<2x8x16xbf16>, vector<2x8x16xf32> -> vector<2x8x16xf32>
    "tpu.trace_stop"() : () -> ()
    %226 = vector.shape_cast %225 : vector<2x8x16xf32> to vector<16x16xf32>
    %227 = arith.truncf %226 : vector<16x16xf32> to vector<16x16xbf16>
    %228 = vector.extract_strided_slice %179 {offsets = [16, 0], sizes = [16, 32], strides = [1, 1]} : vector<32x32xbf16> to vector<16x32xbf16>
    %cst_80 = arith.constant dense<0.000000e+00> : vector<16x32xf32>
    %229 = tpu.matmul %227, %228, %cst_80 {dimension_numbers = #tpu.dot_dimension_numbers<[1], [0], [0], [1], [0, 0, 1, 1], [], []>} : vector<16x16xbf16>, vector<16x32xbf16>, vector<16x32xf32> -> vector<16x32xf32>
    %230 = arith.addf %205, %229 : vector<16x32xf32>
    %c0_81 = arith.constant 0 : index
    %c0_82 = arith.constant 0 : index
    %231 = vector.load %arg19[%c0_81, %c0_82] : memref<1x32xf32, #tpu.memory_space<vmem>>, vector<1x32xf32>
    %232 = vector.broadcast %231 : vector<1x32xf32> to vector<16x32xf32>
    %233 = arith.addf %230, %232 : vector<16x32xf32>
    %234 = arith.addf %233, %168 : vector<16x32xf32>
    %c0_83 = arith.constant 0 : index
    %c0_84 = arith.constant 0 : index
    %235 = vector.load %arg20[%c0_83, %c0_84] : memref<1x32xf32, #tpu.memory_space<vmem>>, vector<1x32xf32>
    %c0_85 = arith.constant 0 : index
    %c0_86 = arith.constant 0 : index
    %236 = vector.load %arg21[%c0_85, %c0_86] : memref<1x32xf32, #tpu.memory_space<vmem>>, vector<1x32xf32>
    %cst_87 = arith.constant dense<0.000000e+00> : vector<16xf32>
    %237 = vector.multi_reduction <add>, %234, %cst_87 [1] : vector<16x32xf32> to vector<16xf32>
    %238 = vector.shape_cast %237 : vector<16xf32> to vector<16x1xf32>
    %cst_88 = arith.constant 3.200000e+01 : f32
    %239 = vector.broadcast %cst_88 : f32 to vector<16x1xf32>
    %240 = arith.divf %238, %239 : vector<16x1xf32>
    %241 = vector.broadcast %240 : vector<16x1xf32> to vector<16x32xf32>
    %242 = arith.subf %234, %241 : vector<16x32xf32>
    %243 = arith.mulf %242, %242 : vector<16x32xf32>
    %cst_89 = arith.constant dense<0.000000e+00> : vector<16xf32>
    %244 = vector.multi_reduction <add>, %243, %cst_89 [1] : vector<16x32xf32> to vector<16xf32>
    %245 = vector.shape_cast %244 : vector<16xf32> to vector<16x1xf32>
    %cst_90 = arith.constant 3.200000e+01 : f32
    %246 = vector.broadcast %cst_90 : f32 to vector<16x1xf32>
    %247 = arith.divf %245, %246 : vector<16x1xf32>
    %248 = vector.broadcast %240 : vector<16x1xf32> to vector<16x32xf32>
    %249 = arith.subf %234, %248 : vector<16x32xf32>
    %cst_91 = arith.constant 9.99999996E-13 : f32
    %250 = vector.broadcast %cst_91 : f32 to vector<16x1xf32>
    %251 = arith.addf %247, %250 : vector<16x1xf32>
    %252 = math.rsqrt %251 : vector<16x1xf32>
    %253 = vector.broadcast %252 : vector<16x1xf32> to vector<16x32xf32>
    %254 = arith.mulf %249, %253 : vector<16x32xf32>
    %255 = vector.broadcast %235 : vector<1x32xf32> to vector<16x32xf32>
    %256 = arith.mulf %254, %255 : vector<16x32xf32>
    %257 = vector.broadcast %236 : vector<1x32xf32> to vector<16x32xf32>
    %258 = arith.addf %256, %257 : vector<16x32xf32>
    %c0_92 = arith.constant 0 : index
    %c0_93 = arith.constant 0 : index
    %259 = vector.load %arg22[%c0_92, %c0_93] : memref<32x64xbf16, #tpu.memory_space<vmem>>, vector<32x64xbf16>
    %260 = arith.truncf %258 : vector<16x32xf32> to vector<16x32xbf16>
    %cst_94 = arith.constant dense<0.000000e+00> : vector<16x64xf32>
    %261 = tpu.matmul %260, %259, %cst_94 {dimension_numbers = #tpu.dot_dimension_numbers<[1], [0], [0], [1], [0, 0, 1, 1], [], []>} : vector<16x32xbf16>, vector<32x64xbf16>, vector<16x64xf32> -> vector<16x64xf32>
    %c0_95 = arith.constant 0 : index
    %c0_96 = arith.constant 0 : index
    %262 = vector.load %arg23[%c0_95, %c0_96] : memref<1x64xf32, #tpu.memory_space<vmem>>, vector<1x64xf32>
    %263 = vector.broadcast %262 : vector<1x64xf32> to vector<16x64xf32>
    %264 = arith.addf %261, %263 : vector<16x64xf32>
    %265 = arith.mulf %264, %264 : vector<16x64xf32>
    %266 = arith.mulf %264, %265 : vector<16x64xf32>
    %cst_97 = arith.constant 4.471500e-02 : f32
    %267 = vector.broadcast %cst_97 : f32 to vector<16x64xf32>
    %268 = arith.mulf %267, %266 : vector<16x64xf32>
    %269 = arith.addf %264, %268 : vector<16x64xf32>
    %cst_98 = arith.constant 0.797884583 : f32
    %270 = vector.broadcast %cst_98 : f32 to vector<16x64xf32>
    %271 = arith.mulf %270, %269 : vector<16x64xf32>
    %272 = math.tanh %271 : vector<16x64xf32>
    %cst_99 = arith.constant 1.000000e+00 : f32
    %273 = vector.broadcast %cst_99 : f32 to vector<16x64xf32>
    %274 = arith.addf %273, %272 : vector<16x64xf32>
    %cst_100 = arith.constant 5.000000e-01 : f32
    %275 = vector.broadcast %cst_100 : f32 to vector<16x64xf32>
    %276 = arith.mulf %275, %274 : vector<16x64xf32>
    %277 = arith.mulf %264, %276 : vector<16x64xf32>
    %c0_101 = arith.constant 0 : index
    %c0_102 = arith.constant 0 : index
    %278 = vector.load %arg24[%c0_101, %c0_102] : memref<64x32xbf16, #tpu.memory_space<vmem>>, vector<64x32xbf16>
    %279 = arith.truncf %277 : vector<16x64xf32> to vector<16x64xbf16>
    %cst_103 = arith.constant dense<0.000000e+00> : vector<16x32xf32>
    %280 = tpu.matmul %279, %278, %cst_103 {dimension_numbers = #tpu.dot_dimension_numbers<[1], [0], [0], [1], [0, 0, 1, 1], [], []>} : vector<16x64xbf16>, vector<64x32xbf16>, vector<16x32xf32> -> vector<16x32xf32>
    %c0_104 = arith.constant 0 : index
    %c0_105 = arith.constant 0 : index
    %281 = vector.load %arg25[%c0_104, %c0_105] : memref<1x32xf32, #tpu.memory_space<vmem>>, vector<1x32xf32>
    %282 = vector.broadcast %281 : vector<1x32xf32> to vector<16x32xf32>
    %283 = arith.addf %280, %282 : vector<16x32xf32>
    %284 = arith.addf %283, %258 : vector<16x32xf32>
    %c0_106 = arith.constant 0 : index
    %c0_107 = arith.constant 0 : index
    %285 = vector.load %arg26[%c0_106, %c0_107] : memref<1x32xf32, #tpu.memory_space<vmem>>, vector<1x32xf32>
    %c0_108 = arith.constant 0 : index
    %c0_109 = arith.constant 0 : index
    %286 = vector.load %arg27[%c0_108, %c0_109] : memref<1x32xf32, #tpu.memory_space<vmem>>, vector<1x32xf32>
    %cst_110 = arith.constant dense<0.000000e+00> : vector<16xf32>
    %287 = vector.multi_reduction <add>, %284, %cst_110 [1] : vector<16x32xf32> to vector<16xf32>
    %288 = vector.shape_cast %287 : vector<16xf32> to vector<16x1xf32>
    %cst_111 = arith.constant 3.200000e+01 : f32
    %289 = vector.broadcast %cst_111 : f32 to vector<16x1xf32>
    %290 = arith.divf %288, %289 : vector<16x1xf32>
    %291 = vector.broadcast %290 : vector<16x1xf32> to vector<16x32xf32>
    %292 = arith.subf %284, %291 : vector<16x32xf32>
    %293 = arith.mulf %292, %292 : vector<16x32xf32>
    %cst_112 = arith.constant dense<0.000000e+00> : vector<16xf32>
    %294 = vector.multi_reduction <add>, %293, %cst_112 [1] : vector<16x32xf32> to vector<16xf32>
    %295 = vector.shape_cast %294 : vector<16xf32> to vector<16x1xf32>
    %cst_113 = arith.constant 3.200000e+01 : f32
    %296 = vector.broadcast %cst_113 : f32 to vector<16x1xf32>
    %297 = arith.divf %295, %296 : vector<16x1xf32>
    %298 = vector.broadcast %290 : vector<16x1xf32> to vector<16x32xf32>
    %299 = arith.subf %284, %298 : vector<16x32xf32>
    %cst_114 = arith.constant 9.99999996E-13 : f32
    %300 = vector.broadcast %cst_114 : f32 to vector<16x1xf32>
    %301 = arith.addf %297, %300 : vector<16x1xf32>
    %302 = math.rsqrt %301 : vector<16x1xf32>
    %303 = vector.broadcast %302 : vector<16x1xf32> to vector<16x32xf32>
    %304 = arith.mulf %299, %303 : vector<16x32xf32>
    %305 = vector.broadcast %285 : vector<1x32xf32> to vector<16x32xf32>
    %306 = arith.mulf %304, %305 : vector<16x32xf32>
    %307 = vector.broadcast %286 : vector<1x32xf32> to vector<16x32xf32>
    %308 = arith.addf %306, %307 : vector<16x32xf32>
    %309 = vector.shape_cast %308 : vector<16x32xf32> to vector<2x8x32xf32>
    %cst_115 = arith.constant dense<0.000000e+00> : vector<2x32xf32>
    %310 = vector.multi_reduction <add>, %309, %cst_115 [1] : vector<2x8x32xf32> to vector<2x32xf32>
    %cst_116 = arith.constant 8.000000e+00 : f32
    %311 = vector.broadcast %cst_116 : f32 to vector<2x32xf32>
    %312 = arith.divf %310, %311 : vector<2x32xf32>
    %c0_117 = arith.constant 0 : index
    %c0_118 = arith.constant 0 : index
    %313 = vector.load %arg28[%c0_117, %c0_118] : memref<32x4xbf16, #tpu.memory_space<vmem>>, vector<32x4xbf16>
    %314 = arith.truncf %312 : vector<2x32xf32> to vector<2x32xbf16>
    %cst_119 = arith.constant dense<0.000000e+00> : vector<2x4xf32>
    %315 = tpu.matmul %314, %313, %cst_119 {dimension_numbers = #tpu.dot_dimension_numbers<[1], [0], [0], [1], [0, 0, 1, 1], [], []>} : vector<2x32xbf16>, vector<32x4xbf16>, vector<2x4xf32> -> vector<2x4xf32>
    %c0_120 = arith.constant 0 : index
    %c0_121 = arith.constant 0 : index
    %316 = vector.load %arg29[%c0_120, %c0_121] : memref<1x4xf32, #tpu.memory_space<vmem>>, vector<1x4xf32>
    %317 = vector.broadcast %316 : vector<1x4xf32> to vector<2x4xf32>
    %318 = arith.addf %315, %317 : vector<2x4xf32>
    %c0_122 = arith.constant 0 : index
    %c0_123 = arith.constant 0 : index
    %319 = vector.load %arg30[%c0_122, %c0_123] : memref<2x4xf32, #tpu.memory_space<vmem>>, vector<2x4xf32>
    tpu.vector_store %arg30[%c0_122, %c0_123], %318 {strides = array<i32>} : memref<2x4xf32, #tpu.memory_space<vmem>>, vector<2x4xf32>,
    return
  }
}

</mosaic_0001>

<bundles_post_ra>
// kernel: intent_classifier_forward.1
= control target key start
LH: loop header
LB: loop body
LE: loop exit
PB: predicated region body
PF: predicated region fallthrough
CT: control target
= control target key end

     0   :  { %s2597_s6 = smov 1   ;;  %s2598_s10 = smov 2   ;;  %s3106_s0 = inlined_call_operand.smem [shape: u32[31], index: -1, kind: input, shape index: {}] }
   0x1   :  { %s2644_s5 = sld [smem:[%s3106_s0]]   ;;  %s2599_s14 = smov 3  }
   0x2   :  { %s2649_s9 = sld [smem:[%s3106_s0 + %s2597_s6]]   ;;  %s2600_s18 = smov 4  }
   0x3   :  { %s2654_s13 = sld [smem:[%s3106_s0 + %s2598_s10]]   ;;  %s2601_s22 = smov 5  }
   0x4   :  { %s2659_s17 = sld [smem:[%s3106_s0 + %s2599_s14]]   ;;  %s2602_s26 = smov 6  }
   0x5   :  { %s2664_s21 = sld [smem:[%s3106_s0 + %s2600_s18]]   ;;  %s2603_s30 = smov 7  }
   0x6   :  { %s2669_s25 = sld [smem:[%s3106_s0 + %s2601_s22]]   ;;  %s2604_s4 = smov 8  }
   0x7   :  { %s2674_s29 = sld [smem:[%s3106_s0 + %s2602_s26]]   ;;  %s2605_s10 = smov 9  }
   0x8   :  { %s2679_s3 = sld [smem:[%s3106_s0 + %s2603_s30]]   ;;  %s2606_s15 = smov 10  }
   0x9   :  { %s2684_s8 = sld [smem:[%s3106_s0 + %s2604_s4]]   ;;  %s2607_s20 = smov 11  }
   0xa   :  { %s2689_s14 = sld [smem:[%s3106_s0 + %s2605_s10]]   ;;  %s2608_s26 = smov 12  }
   0xb   :  { %s2694_s19 = sld [smem:[%s3106_s0 + %s2606_s15]]   ;;  %s2609_s1 = smov 13  }
   0xc   :  { %s2699_s24 = sld [smem:[%s3106_s0 + %s2607_s20]]   ;;  %s2610_s7 = smov 14  }
   0xd   :  { %s2704_s30 = sld [smem:[%s3106_s0 + %s2608_s26]]   ;;  %s2611_s15 = smov 15  }
   0xe   :  { %s2709_s6 = sld [smem:[%s3106_s0 + %s2609_s1]]   ;;  %s2612_s22 = smov 16  }
   0xf   :  { %s2714_s12 = sld [smem:[%s3106_s0 + %s2610_s7]]   ;;  %s2613_s28 = smov 17  }
  0x10   :  { %s2719_s20 = sld [smem:[%s3106_s0 + %s2611_s15]]   ;;  %s2614_s7 = smov 18  }
  0x11   :  { %s2724_s27 = sld [smem:[%s3106_s0 + %s2612_s22]]   ;;  %s2615_s15 = smov 19  }
  0x12   :  { %s2729_s4 = sld [smem:[%s3106_s0 + %s2613_s28]]   ;;  %s2616_s22 = smov 20  }
  0x13   :  { %s2617_s28 = smov 21  }
  0x15   :  { %3111 = sst [smem:[#allocation5_spill]] %s2714_s12 }
  0x16   :  { %3112 = sst [smem:[#allocation6_spill]] %s2719_s20 }
  0x17   :  { %3113 = sst [smem:[#allocation7_spill]] %s2724_s27 }
  0x18   :  { %3114 = sst [smem:[#allocation8_spill]] %s2729_s4 }
  0x19   :  { %s2734_s12 = sld [smem:[%s3106_s0 + %s2614_s7]]   ;;  %s2618_s7 = smov 22  }
  0x1a   :  { %s2739_s20 = sld [smem:[%s3106_s0 + %s2615_s15]]   ;;  %s2619_s15 = smov 23  }
  0x1b   :  { %s2744_s27 = sld [smem:[%s3106_s0 + %s2616_s22]]   ;;  %s2620_s22 = smov 24  }
  0x1c   :  { %s2749_s4 = sld [smem:[%s3106_s0 + %s2617_s28]]   ;;  %s2621_s28 = smov 25  }
  0x1f   :  { %3115 = sst [smem:[#allocation9_spill]] %s2734_s12 }
  0x20   :  { %3116 = sst [smem:[#allocation10_spill]] %s2739_s20 }
  0x21   :  { %3117 = sst [smem:[#allocation11_spill]] %s2744_s27 }
  0x22   :  { %3118 = sst [smem:[#allocation12_spill]] %s2749_s4 }
  0x23   :  { %s2754_s12 = sld [smem:[%s3106_s0 + %s2618_s7]]   ;;  %s2622_s7 = smov 26  }
  0x24   :  { %s2759_s20 = sld [smem:[%s3106_s0 + %s2619_s15]]   ;;  %s2623_s15 = smov 27  }
  0x25   :  { %s2764_s27 = sld [smem:[%s3106_s0 + %s2620_s22]]   ;;  %s2624_s22 = smov 28  }
  0x26   :  { %s2769_s4 = sld [smem:[%s3106_s0 + %s2621_s28]]   ;;  %s2625_s28 = smov 29  }
  0x29   :  { %3119 = sst [smem:[#allocation13_spill]] %s2754_s12 }
  0x2a   :  { %3120 = sst [smem:[#allocation14_spill]] %s2759_s20 }
  0x2b   :  { %3121 = sst [smem:[#allocation15_spill]] %s2764_s27 }
  0x2c   :  { %3122 = sst [smem:[#allocation16_spill]] %s2769_s4 }
  0x2d   :  { %s2774_s12 = sld [smem:[%s3106_s0 + %s2622_s7]]   ;;  %s2626_s7 = smov 30  }
  0x2e   :  { %s2779_s20 = sld [smem:[%s3106_s0 + %s2623_s15]]  }
  0x2f   :  { %s2784_s27 = sld [smem:[%s3106_s0 + %s2624_s22]]  }
  0x30   :  { %s2789_s4 = sld [smem:[%s3106_s0 + %s2625_s28]]  }
  0x33   :  { %3123 = sst [smem:[#allocation17_spill]] %s2774_s12 }
  0x34   :  { %s2794_s12 = sld [smem:[%s3106_s0 + %s2626_s7]]  }
  0x35   :  { %v128_v0 = vld [vmem:[%s2644_s5] sm:$0xff]  ;;  %vm132_vm0 = vcmask 261120   ;;  %v129_v1 = vld [vmem:[%s2644_s5 + $0x8] sm:$0xff] }
  0x36   :  { %v133_v2 = vsel %vm132_vm0, %v128_v0, 0.0  ;;  %v136_v3 = vsel %vm132_vm0, %v129_v1, 0.0 }
  0x37   :  { %134 = vadd.xlane.f32.xlu0 %v133_v2 }
  0x3b   :  { %137 = vadd.xlane.f32.xlu0 %v136_v3 }
  0x3c   :  { %66 = vsyncpa [#allocation3], 0  ;;  %v2491_v14 = vld [vmem:[%s2664_s21] sm:$0xff]   ;;  %v2627_v15 = vmov 0.0   ;;  %v2492_v16 = vld [vmem:[%s2664_s21 + $0x8] sm:$0xff]   ;;  %vm2628_vm1 = vmmov 0   ;;  %v189_v49 = vlaneseq }
  0x3d   :  { %2268 = vmatprep.subr.bf16.mxu0 %v2627_v15  ;;  %2276 = vmatprep.subr.bf16.mxu1 %v2627_v15  ;;  %v2126_v25 = vld [vmem:[%s2654_s13] ss:$0 sm:$0xff]  ;;  %s2629_s0 = smov 96   ;;  %vm290_vm2 = vcmask 130048   ;;  %v2630_v47 = vmov 1966171168  }
  0x3e   :  { %2269 = vmatpush3.bf16.msra.mxu0 %v2491_v14  ;;  %2272 = vmatprep.mubr.msk.bf16.mxu0 %vm2628_vm1, %v2627_v15  ;;  %v2127_v29 = vld [vmem:[%s2659_s17] ss:$0 sm:$0xff]  ;;  %v187_v48 = vunpack.c.l.s4 %v2630_v47  ;;  %v190_v51 = vshrl.u32 %v189_v49, 7  ;;  %vm385_vm3 = vcmask 64512   ;;  %s2631_s5 = smov 64   ;;  %vm415_vm4 = vcmask 1043456  }
  0x3f   :  { %2270 = vmatprep.subr.bf16.mxu0 %v2627_v15  ;;  %2278 = vmatprep.mubr.msk.bf16.mxu1 %vm2628_vm1, %v2627_v15  ;;  %v2129_v34 = vld [vmem:[%s2669_s25] ss:$0 sm:$0xff]  ;;  %s2633_s13 = smov 112   ;;  %s2634_s17 = smov 48   ;;  %vm1010_vm5 = vcmask 523264   ;;  %vm2022_vm6 = vcmask 1041409  }
  0x40   :  { %v188_v50 = vunpack.c.0.s8 %v187_v48  ;;  %v2128_v52 = vld.sshfl [vmem:[%s2649_s9] sm:$0x11 pattern:$0x75316420]  ;;  %v202_v56 = vsub.s32 0, %v190_v51  ;;  %s2632_s9 = smov 80  }
  0x41   :  { %v185_v54 = vcombine.high %v2128_v52, %v2128_v52  ;;  %s3124_s21 = sld [smem:[#allocation7_spill]]  ;;  %s3125_s25 = sld [smem:[#allocation5_spill]]  ;;  %vm2080_vm7 = vcmask 25600  }
  0x42   :  { %2271 = vmatpush3.bf16.msra.mxu0 %v2492_v16  ;;  %v191_v53 = vsub.s32 %v188_v50, %v190_v51  ;;  %s3134_s15 = sld [smem:[#allocation14_spill]]  ;;  %s3135_s16 = sld [smem:[#allocation16_spill]] }
  0x43   :  { %2282 = vmatprep.subr.bf16.mxu0 %v2627_v15  ;;  %s3136_s18 = sld [smem:[#allocation17_spill]] }
  0x44   :  { %v192_v55 = vrot.slane %v2128_v52, %v191_v53  ;;  %v199_v57 = vrot.slane %v185_v54, %v191_v53 }
  0x46   :  { %v2845_v58 = vrot.slane %v192_v55, %v202_v56  ;;  %v2847_v59 = vrot.slane %v199_v57, %v202_v56 }
  0xc4   :  { %v135_v4 = vpop.xlane.xlu0 %134 }
  0xc5   :  { %v140_v5 = vmul.f32 0.03125, %v135_v4 }
  0xc7   :  { %v142_v6 = vsub.f32 %v128_v0, %v140_v5 }
  0xc8   :  { %v138_v7 = vpop.xlane.xlu0 %137 }
  0xc9   :  { %v141_v8 = vmul.f32 0.03125, %v138_v7  ;;  %v144_v9 = vmul.f32 %v142_v6, %v142_v6 }
  0xcb   :  { %v143_v10 = vsub.f32 %v129_v1, %v141_v8  ;;  %v146_v11 = vsel %vm132_vm0, %v144_v9, 0.0 }
  0xcc   :  { %147 = vadd.xlane.f32.xlu1 %v146_v11 }
  0xcd   :  { %v145_v12 = vmul.f32 %v143_v10, %v143_v10 }
  0xcf   :  { %v149_v13 = vsel %vm132_vm0, %v145_v12, 0.0 }
  0xd0   :  { %150 = vadd.xlane.f32.xlu1 %v149_v13 }
 0x159   :  { %v148_v17 = vpop.xlane.xlu1 %147 }
 0x15a   :  { %v152_v18 = vmul.f32 0.03125, %v148_v17 }
 0x15c   :  { %v154_v19 = vadd.f32 1e-12, %v152_v18 }
 0x15d   :  { %v151_v20 = vpop.xlane.xlu1 %150 }
 0x15e   :  { %2513 = vrsqrt.f32 %v154_v19  ;;  %v153_v21 = vmul.f32 0.03125, %v151_v20 }
 0x160   :  { %v155_v22 = vadd.f32 1e-12, %v153_v21 }
 0x162   :  { %2515 = vrsqrt.f32 %v155_v22 }
 0x168   :  { %v2514_v23 = vpop.eup %2513 }
 0x169   :  { %v158_v24 = vmul.f32 %v2514_v23, %v142_v6 }
 0x16b   :  { %v166_v28 = vmul.f32 %v2126_v25, %v158_v24 }
 0x16c   :  { %v2516_v26 = vpop.eup %2515 }
 0x16d   :  { %v159_v27 = vmul.f32 %v2516_v26, %v143_v10  ;;  %v2814_v31 = vadd.f32 %v2127_v29, %v166_v28 }
 0x16f   :  { %v167_v30 = vmul.f32 %v2126_v25, %v159_v27 }
 0x171   :  { %v2816_v32 = vadd.f32 %v2127_v29, %v167_v30 }
 0x173   :  { %v214_v33 = vpack.c.bf16 %v2816_v32, %v2814_v31 }
 0x175   :  { %2273 = vmatmul.mubr.msk.bf16.vlgmr.msra.gmra.mrb[0].mxu0 %vm132_vm0, %v214_v33 }
 0x176   :  { %2284 = vmatprep.mubr.msk.bf16.mxu0 %vm2628_vm1, %v2627_v15 }
 0x248   :  { %v271_v35 = vpop.f32.mrb[0].mxu0 }
 0x249   :  { %v272_v36 = vadd.f32 %v2129_v34, %v271_v35  ;;  %v2274_v37 = vpop.f32.mrb[1].mxu0 }
 0x24a   :  { %v274_v38 = vpop.f32.mrb[2].mxu0 }
 0x24b   :  { %v2824_v39 = vpack.c.bf16 %v272_v36, %v272_v36  ;;  %v275_v40 = vadd.f32 %v2129_v34, %v274_v38  ;;  %v2275_v41 = vpop.f32.mrb[3].mxu0 }
 0x24d   :  { %v2826_v42 = vpack.c.bf16 %v275_v40, %v275_v40  ;;  %288 = vrot.lane.b32.xlu0 %v2824_v39, %s2629_s0 }
 0x24f   :  { %337 = vrot.lane.b32.xlu1 %v2826_v42, %s2629_s0 }
 0x2bf   :  { %v289_v43 = vpop.permute.xlu0 %288 }
 0x2c0   :  { %v295_v44 = vsel %vm290_vm2, %v289_v43, 0 }
 0x2c1   :  { %2277 = vmatpush3.bf16.xpose.msra.mxu1 %v295_v44  ;;  %v338_v45 = vpop.permute.xlu1 %337 }
 0x2c2   :  { %v343_v46 = vsel %vm290_vm2, %v338_v45, 0  ;;  %2288 = vmatprep.subr.bf16.mxu1 %v2627_v15 }
 0x2c3   :  { %2283 = vmatpush3.bf16.xpose.msra.mxu0 %v343_v46 }
 0x2c4   :  { %2294 = vmatprep.subr.bf16.mxu0 %v2627_v15 }
 0x2c8   :  { %2279 = vmatmul.mubr.msk.bf16.vlgmr.msra.gmra.mrb[0].mxu1 %vm290_vm2, %v2824_v39 }
 0x2c9   :  { %2290 = vmatprep.mubr.msk.bf16.mxu1 %vm2628_vm1, %v2627_v15 }
 0x2ca   :  { %2285 = vmatmul.mubr.msk.bf16.vlgmr.msra.gmra.mrb[4].mxu0 %vm290_vm2, %v2826_v42 }
 0x2cb   :  { %2296 = vmatprep.mubr.msk.bf16.mxu0 %vm2628_vm1, %v2627_v15 }
 0x39b   :  { %v331_v60 = vpop.f32.mrb[0].mxu1 }
 0x39c   :  { %v332_v61 = vadd.f32 %v331_v60, %v2845_v58  ;;  %v2280_v62 = vpop.f32.mrb[1].mxu1 }
 0x39d   :  { %v334_v63 = vpop.f32.mrb[2].mxu1  ;;  %v379_v0 = vpop.f32.mrb[4].mxu0 }
 0x39e   :  { %v380_v1 = vadd.f32 %v379_v0, %v2847_v59  ;;  %v2281_v2 = vpop.f32.mrb[3].mxu1  ;;  %v2286_v3 = vpop.f32.mrb[5].mxu0  ;;  %v386_v4 = vsel %vm385_vm3, %v332_v61, -inf }
 0x39f   :  { %387 = vmax.xlane.f32.xlu1 %v386_v4  ;;  %v382_v5 = vpop.f32.mrb[6].mxu0 }
 0x3a0   :  { %v2287_v6 = vpop.f32.mrb[7].mxu0  ;;  %v389_v7 = vsel %vm385_vm3, %v380_v1, -inf }
 0x3a1   :  { %390 = vmax.xlane.f32.xlu0 %v389_v7 }
 0x3b0   :  { %459 = vrot.lane.b32.xlu1 %v2826_v42, %s2631_s5 }
 0x3b4   :  { %510 = vrot.lane.b32.xlu1 %v2824_v39, %s2632_s9 }
 0x42c   :  { %v388_v8 = vpop.xlane.xlu1 %387 }
 0x42d   :  { %v392_v9 = vsub.f32 %v332_v61, %v388_v8 }
 0x42e   :  { %v391_v10 = vpop.xlane.xlu0 %390 }
 0x42f   :  { %v394_v11 = vmul.f32 1.442695, %v392_v9  ;;  %v393_v12 = vsub.f32 %v380_v1, %v391_v10 }
 0x430   :  { %v460_v13 = vpop.permute.xlu1 %459 }
 0x431   :  { %2517 = vpow2.f32 %v394_v11  ;;  %v396_v14 = vmul.f32 1.442695, %v393_v12  ;;  %v465_v16 = vsel %vm415_vm4, %v460_v13, 0 }
 0x432   :  { %2295 = vmatpush3.bf16.msra.mxu0 %v465_v16 }
 0x433   :  { %2519 = vpow2.f32 %v396_v14  ;;  %2306 = vmatprep.subr.bf16.mxu0 %v2627_v15 }
 0x434   :  { %v511_v21 = vpop.permute.xlu1 %510 }
 0x435   :  { %v516_v34 = vsel %vm290_vm2, %v511_v21, 0  ;;  %v2493_v21 = vld [vmem:[%s2674_s29] sm:$0xff]  }
 0x43b   :  { %v2518_v17 = vpop.eup %2517 }
 0x43c   :  { %v398_v18 = vsel %vm385_vm3, %v2518_v17, 0.0 }
 0x43d   :  { %v2520_v19 = vpop.eup %2519  ;;  %399 = vadd.xlane.f32.xlu0 %v398_v18 }
 0x43e   :  { %v401_v20 = vsel %vm385_vm3, %v2520_v19, 0.0 }
 0x43f   :  { %402 = vadd.xlane.f32.xlu1 %v401_v20 }
 0x450   :  { %560 = vrot.lane.b32.xlu1 %v2826_v42, %s2632_s9 }
 0x453   :  { %410 = vrot.lane.b32.xlu0 %v2824_v39, %s2631_s5 }
 0x454   :  { %558 = vrot.lane.b32.xlu1 %v2826_v42, %s2633_s13 }
 0x457   :  { %508 = vrot.lane.b32.xlu0 %v2824_v39, %s2633_s13 }
 0x4ca   :  { %v400_v22 = vpop.xlane.xlu0 %399 }
 0x4cb   :  { %2521 = vrcp.f32 %v400_v22  ;;  %v2494_v22 = vld [vmem:[%s2674_s29 + $0x8] sm:$0xff]   ;;  %s3126_s29 = sld [smem:[#allocation6_spill]] }
 0x4cc   :  { %v403_v23 = vpop.xlane.xlu1 %402 }
 0x4cd   :  { %2523 = vrcp.f32 %v403_v23 }
 0x4ce   :  { %v411_v24 = vpop.permute.xlu0 %410 }
 0x4cf   :  { %v417_v25 = vsel %vm415_vm4, %v411_v24, 0 }
 0x4d0   :  { %2289 = vmatpush3.bf16.msra.mxu1 %v417_v25  ;;  %v561_v33 = vpop.permute.xlu1 %560 }
 0x4d1   :  { %2300 = vmatprep.subr.bf16.mxu1 %v2627_v15  ;;  %v566_v36 = vsel %vm290_vm2, %v561_v33, 0 }
 0x4d2   :  { %v509_v37 = vpop.permute.xlu0 %508 }
 0x4d4   :  { %v559_v38 = vpop.permute.xlu1 %558 }
 0x4d5   :  { %v2522_v26 = vpop.eup %2521 }
 0x4d6   :  { %v406_v27 = vmul.f32 %v2522_v26, %v2518_v17 }
 0x4d7   :  { %v2524_v28 = vpop.eup %2523 }
 0x4d8   :  { %v407_v29 = vmul.f32 %v2524_v28, %v2520_v19  ;;  %v408_v30 = vpack.c.bf16 %v406_v27, %v406_v27 }
 0x4da   :  { %2291 = vmatmul.mubr.msk.bf16.vlgmr.msra.gmra.mrb[4].mxu1 %vm385_vm3, %v408_v30  ;;  %v409_v35 = vpack.c.bf16 %v407_v29, %v407_v29 }
 0x4db   :  { %2301 = vmatpush3.bf16.xpose.msra.mxu1 %v516_v34  ;;  %2302 = vmatprep.mubr.msk.bf16.mxu1 %vm2628_vm1, %v2627_v15 }
 0x4dc   :  { %2297 = vmatmul.mubr.msk.bf16.vlgmr.msra.gmra.mrb[8].mxu0 %vm385_vm3, %v409_v35  ;;  %2312 = vmatprep.subr.bf16.mxu1 %v2627_v15 }
 0x4dd   :  { %2307 = vmatpush3.bf16.xpose.msra.mxu0 %v566_v36  ;;  %2308 = vmatprep.mubr.msk.bf16.mxu0 %vm2628_vm1, %v2627_v15 }
 0x4de   :  { %2318 = vmatprep.subr.bf16.mxu0 %v2627_v15 }
 0x4e2   :  { %2303 = vmatmul.mubr.msk.bf16.vlgmr.msra.gmra.mrb[8].mxu1 %vm290_vm2, %v509_v37 }
 0x4e3   :  { %2314 = vmatprep.mubr.msk.bf16.mxu1 %vm2628_vm1, %v2627_v15 }
 0x4e4   :  { %2309 = vmatmul.mubr.msk.bf16.vlgmr.msra.gmra.mrb[12].mxu0 %vm290_vm2, %v559_v38 }
 0x4e5   :  { %2320 = vmatprep.mubr.msk.bf16.mxu0 %vm2628_vm1, %v2627_v15 }
 0x5ad   :  { %v2887_v40 = vpop.f32.mrb[4].mxu1 }
 0x5ae   :  { %v2292_v41 = vpop.f32.mrb[5].mxu1 }
 0x5af   :  { %v456_v43 = vpop.f32.mrb[6].mxu1  ;;  %v2889_v44 = vpop.f32.mrb[8].mxu0 }
 0x5b0   :  { %v507_v45 = vpack.c.bf16 %v2889_v44, %v2887_v40  ;;  %v2293_v46 = vpop.f32.mrb[7].mxu1  ;;  %v2298_v47 = vpop.f32.mrb[9].mxu0  ;;  %v2147_v40 = vld [vmem:[%s2679_s3] ss:$0 sm:$0xff]  ;;  %s3127_s3 = sld [smem:[#allocation8_spill]] }
 0x5b1   :  { %v504_v48 = vpop.f32.mrb[10].mxu0 }
 0x5b2   :  { %v2299_v49 = vpop.f32.mrb[11].mxu0 }
 0x5b5   :  { %v552_v50 = vpop.f32.mrb[8].mxu1 }
 0x5b6   :  { %v553_v51 = vadd.f32 %v552_v50, %v2845_v58  ;;  %v2304_v52 = vpop.f32.mrb[9].mxu1 }
 0x5b7   :  { %v555_v53 = vpop.f32.mrb[10].mxu1  ;;  %v602_v54 = vpop.f32.mrb[12].mxu0 }
 0x5b8   :  { %v603_v55 = vadd.f32 %v602_v54, %v2847_v59  ;;  %v2305_v56 = vpop.f32.mrb[11].mxu1  ;;  %v2310_v57 = vpop.f32.mrb[13].mxu0  ;;  %v608_v60 = vsel %vm385_vm3, %v553_v51, -inf }
 0x5b9   :  { %609 = vmax.xlane.f32.xlu0 %v608_v60  ;;  %v605_v61 = vpop.f32.mrb[14].mxu0 }
 0x5ba   :  { %v2311_v62 = vpop.f32.mrb[15].mxu0  ;;  %v611_v63 = vsel %vm385_vm3, %v603_v55, -inf }
 0x5bb   :  { %612 = vmax.xlane.f32.xlu1 %v611_v63 }
 0x5cc   :  { %680 = vrot.lane.b32.xlu1 %v2826_v42, %s2634_s17 }
 0x646   :  { %v610_v0 = vpop.xlane.xlu0 %609 }
 0x647   :  { %v614_v1 = vsub.f32 %v553_v51, %v610_v0  ;;  %v2496_v0 = vld [vmem:[%s2694_s19 + $0x8] sm:$0xff]  }
 0x648   :  { %v613_v2 = vpop.xlane.xlu1 %612 }
 0x649   :  { %v616_v3 = vmul.f32 1.442695, %v614_v1  ;;  %v615_v4 = vsub.f32 %v603_v55, %v613_v2 }
 0x64b   :  { %2525 = vpow2.f32 %v616_v3  ;;  %v618_v5 = vmul.f32 1.442695, %v615_v4 }
 0x64c   :  { %v681_v6 = vpop.permute.xlu1 %680 }
 0x64d   :  { %2527 = vpow2.f32 %v618_v5  ;;  %v686_v7 = vsel %vm415_vm4, %v681_v6, 0 }
 0x64e   :  { %2319 = vmatpush3.bf16.msra.mxu0 %v686_v7 }
 0x64f   :  { %2330 = vmatprep.subr.bf16.mxu0 %v2627_v15 }
 0x655   :  { %v2526_v8 = vpop.eup %2525 }
 0x656   :  { %v620_v9 = vsel %vm385_vm3, %v2526_v8, 0.0 }
 0x657   :  { %v2528_v10 = vpop.eup %2527  ;;  %621 = vadd.xlane.f32.xlu0 %v620_v9 }
 0x658   :  { %v623_v42 = vsel %vm385_vm3, %v2528_v10, 0.0 }
 0x65b   :  { %624 = vadd.xlane.f32.xlu0 %v623_v42 }
 0x671   :  { %632 = vrot.lane.b32.xlu0 %v2824_v39, %s2634_s17 }
 0x6e4   :  { %v622_v11 = vpop.xlane.xlu0 %621 }
 0x6e5   :  { %2529 = vrcp.f32 %v622_v11 }
 0x6e8   :  { %v625_v12 = vpop.xlane.xlu0 %624 }
 0x6e9   :  { %2531 = vrcp.f32 %v625_v12  ;;  %v2149_v12 = vld [vmem:[%s2689_s14] ss:$0 sm:$0xff]  ;;  %s3129_s14 = sld [smem:[#allocation10_spill]] }
 0x6ec   :  { %v633_v13 = vpop.permute.xlu0 %632 }
 0x6ed   :  { %v638_v14 = vsel %vm415_vm4, %v633_v13, 0 }
 0x6ee   :  { %2313 = vmatpush3.bf16.msra.mxu1 %v638_v14 }
 0x6ef   :  { %v2530_v16 = vpop.eup %2529  ;;  %2324 = vmatprep.subr.bf16.mxu1 %v2627_v15 }
 0x6f0   :  { %v628_v17 = vmul.f32 %v2530_v16, %v2526_v8  ;;  %v2148_v8 = vld [vmem:[%s2684_s8] ss:$0 sm:$0xff]  ;;  %s3128_s8 = sld [smem:[#allocation9_spill]] }
 0x6f2   :  { %v630_v18 = vpack.c.bf16 %v628_v17, %v628_v17 }
 0x6f3   :  { %v2532_v19 = vpop.eup %2531 }
 0x6f4   :  { %v629_v20 = vmul.f32 %v2532_v19, %v2528_v10  ;;  %2315 = vmatmul.mubr.msk.bf16.vlgmr.msra.gmra.mrb[12].mxu1 %vm385_vm3, %v630_v18  ;;  %v2497_v18 = vld [vmem:[%s2704_s30] sm:$0xff]   ;;  %v2498_v19 = vld [vmem:[%s2704_s30 + $0x8] sm:$0xff]  }
 0x6f5   :  { %2326 = vmatprep.mubr.msk.bf16.mxu1 %vm2628_vm1, %v2627_v15  ;;  %2325 = vmatpush3.bf16.msra.mxu1 %v2494_v22 }
 0x6f6   :  { %v631_v39 = vpack.c.bf16 %v629_v20, %v629_v20  ;;  %2336 = vmatprep.subr.bf16.mxu1 %v2627_v15  ;;  %v2499_v20 = vld [vmem:[%s2704_s30 + $0x10] sm:$0xff]  }
 0x6f8   :  { %2321 = vmatmul.mubr.msk.bf16.vlgmr.msra.gmra.mrb[16].mxu0 %vm385_vm3, %v631_v39  ;;  %v2150_v39 = vld [vmem:[%s2699_s24] ss:$0 sm:$0xff]  ;;  %s3131_s24 = sld [smem:[#allocation11_spill]] }
 0x6f9   :  { %2331 = vmatpush3.bf16.msra.mxu0 %v2493_v21  ;;  %2332 = vmatprep.mubr.msk.bf16.mxu0 %vm2628_vm1, %v2627_v15  ;;  %v2500_v21 = vld [vmem:[%s2704_s30 + $0x18] sm:$0xff]   ;;  %s3132_s30 = sld [smem:[#allocation12_spill]] }
 0x6fa   :  { %2344 = vmatprep.subr.bf16.mxu0 %v2627_v15 }
 0x700   :  { %2333 = vmatmul.mubr.msk.bf16.vlgmr.msra.gmra.mrb[20].mxu0 %vm290_vm2, %v507_v45 }
 0x701   :  { %2352 = vmatprep.mubr.msk.bf16.mxu0 %vm2628_vm1, %v2627_v15  ;;  %2345 = vmatpush3.bf16.msra.mxu0 %v2497_v18 }
 0x702   :  { %2346 = vmatprep.subr.bf16.mxu0 %v2627_v15 }
 0x705   :  { %2347 = vmatpush3.bf16.msra.mxu0 %v2498_v19 }
 0x706   :  { %2348 = vmatprep.subr.bf16.mxu0 %v2627_v15 }
 0x709   :  { %2349 = vmatpush3.bf16.msra.mxu0 %v2499_v20 }
 0x70a   :  { %2350 = vmatprep.subr.bf16.mxu0 %v2627_v15 }
 0x70d   :  { %2351 = vmatpush3.bf16.msra.mxu0 %v2500_v21 }
 0x70e   :  { %2370 = vmatprep.subr.bf16.mxu0 %v2627_v15 }
 0x7c7   :  { %v674_v23 = vpop.f32.mrb[12].mxu1 }
 0x7c8   :  { %v2316_v24 = vpop.f32.mrb[13].mxu1 }
 0x7c9   :  { %v677_v25 = vpop.f32.mrb[14].mxu1 }
 0x7ca   :  { %v2317_v26 = vpop.f32.mrb[15].mxu1 }
 0x7cb   :  { %v722_v27 = vpop.f32.mrb[16].mxu0 }
 0x7cc   :  { %v728_v28 = vpack.c.bf16 %v722_v27, %v674_v23  ;;  %v2322_v29 = vpop.f32.mrb[17].mxu0 }
 0x7cd   :  { %v725_v30 = vpop.f32.mrb[18].mxu0 }
 0x7ce   :  { %v2323_v33 = vpop.f32.mrb[19].mxu0  ;;  %2327 = vmatmul.mubr.msk.bf16.vlgmr.msra.gmra.mrb[16].mxu1 %vm290_vm2, %v728_v28 }
 0x7cf   :  { %2340 = vmatprep.mubr.msk.bf16.mxu1 %vm2628_vm1, %v2627_v15 }
 0x7d3   :  { %v822_v34 = vpop.f32.mrb[20].mxu0 }
 0x7d4   :  { %v2334_v35 = vpop.f32.mrb[21].mxu0 }
 0x7d5   :  { %v825_v36 = vpop.f32.mrb[22].mxu0 }
 0x7d6   :  { %v2335_v37 = vpop.f32.mrb[23].mxu0 }
 0x8a1   :  { %v772_v38 = vpop.f32.mrb[16].mxu1 }
 0x8a2   :  { %v823_v41 = vadd.f32 %v822_v34, %v772_v38  ;;  %v2328_v43 = vpop.f32.mrb[17].mxu1 }
 0x8a3   :  { %v775_v44 = vpop.f32.mrb[18].mxu1 }
 0x8a4   :  { %v836_v45 = vadd.f32 %v2147_v40, %v823_v41  ;;  %v826_v46 = vadd.f32 %v825_v36, %v775_v44  ;;  %v2329_v47 = vpop.f32.mrb[19].mxu1 }
 0x8a6   :  { %v837_v48 = vadd.f32 %v2147_v40, %v826_v46  ;;  %v838_v49 = vadd.f32 %v836_v45, %v2814_v31 }
 0x8a8   :  { %v842_v50 = vsel %vm132_vm0, %v838_v49, 0.0  ;;  %v839_v51 = vadd.f32 %v837_v48, %v2816_v32  ;;  %v2495_v32 = vld [vmem:[%s2694_s19] sm:$0xff]   ;;  %s3130_s19 = sld [smem:[#allocation13_spill]] }
 0x8a9   :  { %843 = vadd.xlane.f32.xlu1 %v842_v50  ;;  %2337 = vmatpush3.bf16.msra.mxu1 %v2495_v32 }
 0x8aa   :  { %v845_v52 = vsel %vm132_vm0, %v839_v51, 0.0  ;;  %2338 = vmatprep.subr.bf16.mxu1 %v2627_v15 }
 0x8ab   :  { %846 = vadd.xlane.f32.xlu0 %v845_v52 }
 0x8ad   :  { %2339 = vmatpush3.bf16.msra.mxu1 %v2496_v0 }
 0x8ae   :  { %2356 = vmatprep.subr.bf16.mxu1 %v2627_v15 }
 0x936   :  { %v844_v53 = vpop.xlane.xlu1 %843 }
 0x937   :  { %v848_v54 = vmul.f32 0.03125, %v844_v53 }
 0x938   :  { %v847_v55 = vpop.xlane.xlu0 %846 }
 0x939   :  { %v850_v56 = vsub.f32 %v838_v49, %v848_v54  ;;  %v849_v57 = vmul.f32 0.03125, %v847_v55 }
 0x93b   :  { %v851_v60 = vsub.f32 %v839_v51, %v849_v57  ;;  %v852_v61 = vmul.f32 %v850_v56, %v850_v56  ;;  %v2154_v51 = vld [vmem:[%s2709_s6] ss:$0 sm:$0xff]  ;;  %s3133_s6 = sld [smem:[#allocation15_spill]] }
 0x93d   :  { %v854_v62 = vsel %vm132_vm0, %v852_v61, 0.0  ;;  %v853_v31 = vmul.f32 %v851_v60, %v851_v60 }
 0x93e   :  { %855 = vadd.xlane.f32.xlu0 %v854_v62 }
 0x93f   :  { %v857_v63 = vsel %vm132_vm0, %v853_v31, 0.0 }
 0x940   :  { %858 = vadd.xlane.f32.xlu1 %v857_v63 }
 0x9cb   :  { %v856_v1 = vpop.xlane.xlu0 %855 }
 0x9cc   :  { %v860_v2 = vmul.f32 0.03125, %v856_v1 }
 0x9cd   :  { %v859_v3 = vpop.xlane.xlu1 %858 }
 0x9ce   :  { %v862_v4 = vadd.f32 1e-12, %v860_v2  ;;  %v861_v5 = vmul.f32 0.03125, %v859_v3 }
 0x9d0   :  { %2533 = vrsqrt.f32 %v862_v4  ;;  %v863_v6 = vadd.f32 1e-12, %v861_v5 }
 0x9d2   :  { %2535 = vrsqrt.f32 %v863_v6 }
 0x9da   :  { %v2534_v7 = vpop.eup %2533 }
 0x9db   :  { %v866_v9 = vmul.f32 %v2534_v7, %v850_v56 }
 0x9dc   :  { %v2536_v10 = vpop.eup %2535 }
 0x9dd   :  { %v874_v42 = vmul.f32 %v2148_v8, %v866_v9  ;;  %v867_v11 = vmul.f32 %v2536_v10, %v851_v60  ;;  %v2502_v9 = vld [vmem:[%s3124_s21 + $0x8] sm:$0xff]  }
 0x9df   :  { %v875_v13 = vmul.f32 %v2148_v8, %v867_v11  ;;  %v882_v14 = vadd.f32 %v2149_v12, %v874_v42  ;;  %v2501_v8 = vld [vmem:[%s3124_s21] sm:$0xff]  }
 0x9e1   :  { %v883_v16 = vadd.f32 %v2149_v12, %v875_v13 }
 0x9e3   :  { %v888_v17 = vpack.c.bf16 %v883_v16, %v882_v14 }
 0x9e5   :  { %2341 = vmatmul.mubr.msk.bf16.vlgmr.msra.gmra.mrb[20].mxu1 %vm132_vm0, %v888_v17  ;;  %v2160_v17 = vld [vmem:[%s3125_s25] ss:$0 sm:$0xff] }
 0x9e6   :  { %2360 = vmatprep.mubr.msk.bf16.mxu1 %vm2628_vm1, %v2627_v15  ;;  %2357 = vmatpush3.bf16.msra.mxu1 %v2501_v8 }
 0x9e7   :  { %2358 = vmatprep.subr.bf16.mxu1 %v2627_v15 }
 0x9ea   :  { %2359 = vmatpush3.bf16.msra.mxu1 %v2502_v9 }
 0x9eb   :  { %2364 = vmatprep.subr.bf16.mxu1 %v2627_v15 }
 0xab8   :  { %v945_v22 = vpop.f32.mrb[20].mxu1 }
 0xab9   :  { %v946_v23 = vadd.f32 %v2150_v39, %v945_v22  ;;  %v2342_v24 = vpop.f32.mrb[21].mxu1 }
 0xaba   :  { %v948_v25 = vpop.f32.mrb[22].mxu1 }
 0xabb   :  { %v952_v26 = vmul.f32 %v946_v23, %v946_v23  ;;  %v949_v27 = vadd.f32 %v2150_v39, %v948_v25  ;;  %v2343_v28 = vpop.f32.mrb[23].mxu1  ;;  %v2161_v39 = vld [vmem:[%s3126_s29] ss:$0 sm:$0xff] }
 0xabd   :  { %v954_v29 = vmul.f32 %v952_v26, %v946_v23  ;;  %v953_v30 = vmul.f32 %v949_v27, %v949_v27  ;;  %v2162_v26 = vld [vmem:[%s3127_s3] ss:$0 sm:$0xff] }
 0xabf   :  { %v956_v33 = vmul.f32 0.044715, %v954_v29  ;;  %v955_v34 = vmul.f32 %v953_v30, %v949_v27 }
 0xac1   :  { %v958_v35 = vadd.f32 %v956_v33, %v946_v23  ;;  %v957_v36 = vmul.f32 0.044715, %v955_v34 }
 0xac3   :  { %v960_v37 = vmul.f32 0.7978846, %v958_v35  ;;  %v959_v38 = vadd.f32 %v957_v36, %v949_v27 }
 0xac5   :  { %2537 = vtanh.f32 %v960_v37  ;;  %v961_v40 = vmul.f32 0.7978846, %v959_v38 }
 0xac7   :  { %2539 = vtanh.f32 %v961_v40 }
 0xacf   :  { %v2538_v41 = vpop.eup %2537 }
 0xad0   :  { %v964_v43 = vadd.f32 1.0, %v2538_v41 }
 0xad1   :  { %v2540_v44 = vpop.eup %2539 }
 0xad2   :  { %v966_v45 = vmul.f32 0.5, %v964_v43  ;;  %v965_v46 = vadd.f32 1.0, %v2540_v44 }
 0xad4   :  { %v967_v47 = vmul.f32 0.5, %v965_v46  ;;  %v968_v48 = vmul.f32 %v966_v45, %v946_v23 }
 0xad6   :  { %v969_v49 = vmul.f32 %v967_v47, %v949_v27 }
 0xad8   :  { %v978_v50 = vpack.c.bf16 %v969_v49, %v968_v48 }
 0xada   :  { %2353 = vmatmul.mubr.msk.bf16.vlgmr.msra.gmra.mrb[24].mxu0 %vm1010_vm5, %v978_v50 }
 0xadb   :  { %2372 = vmatprep.mubr.msk.bf16.mxu0 %vm2628_vm1, %v2627_v15 }
 0xbad   :  { %v1048_v52 = vpop.f32.mrb[24].mxu0 }
 0xbae   :  { %v1049_v53 = vadd.f32 %v2154_v51, %v1048_v52  ;;  %v2354_v54 = vpop.f32.mrb[25].mxu0 }
 0xbaf   :  { %v1051_v55 = vpop.f32.mrb[26].mxu0 }
 0xbb0   :  { %v1052_v56 = vadd.f32 %v2154_v51, %v1051_v55  ;;  %v2355_v57 = vpop.f32.mrb[27].mxu0  ;;  %v1055_v60 = vadd.f32 %v1049_v53, %v882_v14 }
 0xbb2   :  { %v1059_v61 = vsel %vm132_vm0, %v1055_v60, 0.0  ;;  %v1056_v62 = vadd.f32 %v1052_v56, %v883_v16 }
 0xbb3   :  { %1060 = vadd.xlane.f32.xlu0 %v1059_v61 }
 0xbb4   :  { %v1062_v31 = vsel %vm132_vm0, %v1056_v62, 0.0 }
 0xbb5   :  { %1063 = vadd.xlane.f32.xlu1 %v1062_v31 }
 0xc40   :  { %v1061_v63 = vpop.xlane.xlu0 %1060 }
 0xc41   :  { %v1065_v32 = vmul.f32 0.03125, %v1061_v63 }
 0xc42   :  { %v1064_v0 = vpop.xlane.xlu1 %1063 }
 0xc43   :  { %v1067_v1 = vsub.f32 %v1055_v60, %v1065_v32  ;;  %v1066_v2 = vmul.f32 0.03125, %v1064_v0 }
 0xc45   :  { %v1068_v3 = vsub.f32 %v1056_v62, %v1066_v2  ;;  %v1069_v4 = vmul.f32 %v1067_v1, %v1067_v1 }
 0xc47   :  { %v1071_v5 = vsel %vm132_vm0, %v1069_v4, 0.0  ;;  %v1070_v6 = vmul.f32 %v1068_v3, %v1068_v3 }
 0xc48   :  { %1072 = vadd.xlane.f32.xlu0 %v1071_v5 }
 0xc49   :  { %v1074_v7 = vsel %vm132_vm0, %v1070_v6, 0.0 }
 0xc4a   :  { %1075 = vadd.xlane.f32.xlu1 %v1074_v7 }
 0xcd5   :  { %v1073_v10 = vpop.xlane.xlu0 %1072 }
 0xcd6   :  { %v1077_v42 = vmul.f32 0.03125, %v1073_v10 }
 0xcd7   :  { %v1076_v11 = vpop.xlane.xlu1 %1075 }
 0xcd8   :  { %v1079_v12 = vadd.f32 1e-12, %v1077_v42  ;;  %v1078_v13 = vmul.f32 0.03125, %v1076_v11 }
 0xcda   :  { %2541 = vrsqrt.f32 %v1079_v12  ;;  %v1080_v14 = vadd.f32 1e-12, %v1078_v13 }
 0xcdc   :  { %2543 = vrsqrt.f32 %v1080_v14 }
 0xce4   :  { %v2542_v16 = vpop.eup %2541 }
 0xce5   :  { %v1083_v18 = vmul.f32 %v2542_v16, %v1067_v1 }
 0xce6   :  { %v2544_v19 = vpop.eup %2543 }
 0xce7   :  { %v1091_v20 = vmul.f32 %v2160_v17, %v1083_v18  ;;  %v1084_v21 = vmul.f32 %v2544_v19, %v1068_v3 }
 0xce9   :  { %v1092_v22 = vmul.f32 %v2160_v17, %v1084_v21  ;;  %v2962_v23 = vadd.f32 %v2161_v39, %v1091_v20 }
 0xceb   :  { %v2964_v24 = vadd.f32 %v2161_v39, %v1092_v22 }
 0xced   :  { %v1105_v25 = vpack.c.bf16 %v2964_v24, %v2962_v23 }
 0xcef   :  { %2361 = vmatmul.mubr.msk.bf16.vlgmr.msra.gmra.mrb[24].mxu1 %vm132_vm0, %v1105_v25 }
 0xcf0   :  { %2366 = vmatprep.mubr.msk.bf16.mxu1 %vm2628_vm1, %v2627_v15 }
 0xdc2   :  { %v1162_v27 = vpop.f32.mrb[24].mxu1 }
 0xdc3   :  { %v1163_v28 = vadd.f32 %v2162_v26, %v1162_v27  ;;  %v2362_v29 = vpop.f32.mrb[25].mxu1 }
 0xdc4   :  { %v1165_v30 = vpop.f32.mrb[26].mxu1 }
 0xdc5   :  { %v2972_v33 = vpack.c.bf16 %v1163_v28, %v1163_v28  ;;  %v1166_v34 = vadd.f32 %v2162_v26, %v1165_v30  ;;  %v2363_v35 = vpop.f32.mrb[27].mxu1 }
 0xdc7   :  { %v2974_v36 = vpack.c.bf16 %v1166_v34, %v1166_v34  ;;  %1179 = vrot.lane.b32.xlu0 %v2972_v33, %s2629_s0 }
 0xdc9   :  { %1227 = vrot.lane.b32.xlu1 %v2974_v36, %s2629_s0 }
 0xe39   :  { %v1180_v37 = vpop.permute.xlu0 %1179 }
 0xe3a   :  { %v1185_v38 = vsel %vm290_vm2, %v1180_v37, 0 }
 0xe3b   :  { %2365 = vmatpush3.bf16.xpose.msra.mxu1 %v1185_v38  ;;  %v1228_v40 = vpop.permute.xlu1 %1227 }
 0xe3c   :  { %v1233_v41 = vsel %vm290_vm2, %v1228_v40, 0  ;;  %2376 = vmatprep.subr.bf16.mxu1 %v2627_v15 }
 0xe3d   :  { %2371 = vmatpush3.bf16.xpose.msra.mxu0 %v1233_v41 }
 0xe3e   :  { %2382 = vmatprep.subr.bf16.mxu0 %v2627_v15 }
 0xe42   :  { %2367 = vmatmul.mubr.msk.bf16.vlgmr.msra.gmra.mrb[28].mxu1 %vm290_vm2, %v2972_v33 }
 0xe43   :  { %2378 = vmatprep.mubr.msk.bf16.mxu1 %vm2628_vm1, %v2627_v15 }
 0xe44   :  { %2373 = vmatmul.mubr.msk.bf16.vlgmr.msra.gmra.mrb[28].mxu0 %vm290_vm2, %v2974_v36 }
 0xe45   :  { %2384 = vmatprep.mubr.msk.bf16.mxu0 %vm2628_vm1, %v2627_v15 }
 0xf15   :  { %v1221_v43 = vpop.f32.mrb[28].mxu1 }
 0xf16   :  { %v1222_v44 = vadd.f32 %v1221_v43, %v2845_v58  ;;  %v2368_v45 = vpop.f32.mrb[29].mxu1 }
 0xf17   :  { %v1224_v46 = vpop.f32.mrb[30].mxu1  ;;  %v1269_v47 = vpop.f32.mrb[28].mxu0 }
 0xf18   :  { %v1270_v48 = vadd.f32 %v1269_v47, %v2847_v59  ;;  %v2369_v49 = vpop.f32.mrb[31].mxu1  ;;  %v2374_v50 = vpop.f32.mrb[29].mxu0  ;;  %v1275_v51 = vsel %vm385_vm3, %v1222_v44, -inf }
 0xf19   :  { %1276 = vmax.xlane.f32.xlu1 %v1275_v51  ;;  %v1272_v52 = vpop.f32.mrb[30].mxu0 }
 0xf1a   :  { %v2375_v53 = vpop.f32.mrb[31].mxu0  ;;  %v1278_v54 = vsel %vm385_vm3, %v1270_v48, -inf }
 0xf1b   :  { %1279 = vmax.xlane.f32.xlu0 %v1278_v54 }
 0xf2a   :  { %1347 = vrot.lane.b32.xlu1 %v2974_v36, %s2631_s5 }
 0xf2e   :  { %1398 = vrot.lane.b32.xlu1 %v2972_v33, %s2632_s9 }
 0xfa6   :  { %v1277_v55 = vpop.xlane.xlu1 %1276 }
 0xfa7   :  { %v1281_v56 = vsub.f32 %v1222_v44, %v1277_v55 }
 0xfa8   :  { %v1280_v57 = vpop.xlane.xlu0 %1279 }
 0xfa9   :  { %v1283_v60 = vmul.f32 1.442695, %v1281_v56  ;;  %v1282_v61 = vsub.f32 %v1270_v48, %v1280_v57 }
 0xfaa   :  { %v1348_v62 = vpop.permute.xlu1 %1347 }
 0xfab   :  { %2545 = vpow2.f32 %v1283_v60  ;;  %v1285_v31 = vmul.f32 1.442695, %v1282_v61  ;;  %v1353_v63 = vsel %vm415_vm4, %v1348_v62, 0 }
 0xfac   :  { %2383 = vmatpush3.bf16.msra.mxu0 %v1353_v63 }
 0xfad   :  { %2547 = vpow2.f32 %v1285_v31  ;;  %2394 = vmatprep.subr.bf16.mxu0 %v2627_v15 }
 0xfae   :  { %v1399_v3 = vpop.permute.xlu1 %1398 }
 0xfaf   :  { %v1404_v13 = vsel %vm290_vm2, %v1399_v3, 0 }
 0xfb5   :  { %v2546_v32 = vpop.eup %2545 }
 0xfb6   :  { %v1287_v0 = vsel %vm385_vm3, %v2546_v32, 0.0 }
 0xfb7   :  { %v2548_v1 = vpop.eup %2547  ;;  %1288 = vadd.xlane.f32.xlu0 %v1287_v0 }
 0xfb8   :  { %v1290_v2 = vsel %vm385_vm3, %v2548_v1, 0.0 }
 0xfb9   :  { %1291 = vadd.xlane.f32.xlu1 %v1290_v2  ;;  %v2504_v2 = vld [vmem:[%s3128_s8 + $0x8] sm:$0xff]  }
 0xfca   :  { %1448 = vrot.lane.b32.xlu1 %v2974_v36, %s2632_s9 }
 0xfcd   :  { %1299 = vrot.lane.b32.xlu0 %v2972_v33, %s2631_s5 }
 0xfce   :  { %1446 = vrot.lane.b32.xlu1 %v2974_v36, %s2633_s13 }
 0xfd1   :  { %1396 = vrot.lane.b32.xlu0 %v2972_v33, %s2633_s13 }
0x1044   :  { %v1289_v4 = vpop.xlane.xlu0 %1288 }
0x1045   :  { %2549 = vrcp.f32 %v1289_v4 }
0x1046   :  { %v1292_v5 = vpop.xlane.xlu1 %1291 }
0x1047   :  { %2551 = vrcp.f32 %v1292_v5 }
0x1048   :  { %v1300_v6 = vpop.permute.xlu0 %1299 }
0x1049   :  { %v1305_v7 = vsel %vm415_vm4, %v1300_v6, 0 }
0x104a   :  { %2377 = vmatpush3.bf16.msra.mxu1 %v1305_v7  ;;  %v1449_v12 = vpop.permute.xlu1 %1448 }
0x104b   :  { %2388 = vmatprep.subr.bf16.mxu1 %v2627_v15  ;;  %v1454_v16 = vsel %vm290_vm2, %v1449_v12, 0 }
0x104c   :  { %v1397_v17 = vpop.permute.xlu0 %1396 }
0x104e   :  { %v1447_v18 = vpop.permute.xlu1 %1446 }
0x104f   :  { %v2550_v8 = vpop.eup %2549 }
0x1050   :  { %v1295_v9 = vmul.f32 %v2550_v8, %v2546_v32 }
0x1051   :  { %v2552_v10 = vpop.eup %2551 }
0x1052   :  { %v1296_v42 = vmul.f32 %v2552_v10, %v2548_v1  ;;  %v1297_v11 = vpack.c.bf16 %v1295_v9, %v1295_v9  ;;  %v2503_v1 = vld [vmem:[%s3128_s8] sm:$0xff]  }
0x1054   :  { %2379 = vmatmul.mubr.msk.bf16.vlgmr.msra.gmra.mrb[32].mxu1 %vm385_vm3, %v1297_v11  ;;  %v1298_v14 = vpack.c.bf16 %v1296_v42, %v1296_v42 }
0x1055   :  { %2389 = vmatpush3.bf16.xpose.msra.mxu1 %v1404_v13  ;;  %2390 = vmatprep.mubr.msk.bf16.mxu1 %vm2628_vm1, %v2627_v15 }
0x1056   :  { %2385 = vmatmul.mubr.msk.bf16.vlgmr.msra.gmra.mrb[32].mxu0 %vm385_vm3, %v1298_v14  ;;  %2400 = vmatprep.subr.bf16.mxu1 %v2627_v15 }
0x1057   :  { %2395 = vmatpush3.bf16.xpose.msra.mxu0 %v1454_v16  ;;  %2396 = vmatprep.mubr.msk.bf16.mxu0 %vm2628_vm1, %v2627_v15 }
0x1058   :  { %2406 = vmatprep.subr.bf16.mxu0 %v2627_v15 }
0x105c   :  { %2391 = vmatmul.mubr.msk.bf16.vlgmr.msra.gmra.mrb[36].mxu1 %vm290_vm2, %v1397_v17  ;;  %v2180_v17 = vld [vmem:[%s3129_s14] ss:$0 sm:$0xff] }
0x105d   :  { %2402 = vmatprep.mubr.msk.bf16.mxu1 %vm2628_vm1, %v2627_v15 }
0x105e   :  { %2397 = vmatmul.mubr.msk.bf16.vlgmr.msra.gmra.mrb[36].mxu0 %vm290_vm2, %v1447_v18 }
0x105f   :  { %2408 = vmatprep.mubr.msk.bf16.mxu0 %vm2628_vm1, %v2627_v15 }
0x1127   :  { %v3030_v19 = vpop.f32.mrb[32].mxu1 }
0x1128   :  { %v2380_v20 = vpop.f32.mrb[33].mxu1 }
0x1129   :  { %v1344_v21 = vpop.f32.mrb[34].mxu1  ;;  %v1389_v39 = vpop.f32.mrb[32].mxu0 }
0x112a   :  { %v1395_v22 = vpack.c.bf16 %v1389_v39, %v3030_v19  ;;  %v2381_v25 = vpop.f32.mrb[35].mxu1  ;;  %v2386_v26 = vpop.f32.mrb[33].mxu0 }
0x112b   :  { %v1392_v27 = vpop.f32.mrb[34].mxu0 }
0x112c   :  { %v2387_v28 = vpop.f32.mrb[35].mxu0 }
0x112f   :  { %v1440_v29 = vpop.f32.mrb[36].mxu1 }
0x1130   :  { %v1441_v30 = vadd.f32 %v1440_v29, %v2845_v58  ;;  %v2392_v34 = vpop.f32.mrb[37].mxu1 }
0x1131   :  { %v1443_v35 = vpop.f32.mrb[38].mxu1  ;;  %v1490_v37 = vpop.f32.mrb[36].mxu0 }
0x1132   :  { %v1491_v38 = vadd.f32 %v1490_v37, %v2847_v59  ;;  %v2393_v40 = vpop.f32.mrb[39].mxu1  ;;  %v2398_v41 = vpop.f32.mrb[37].mxu0  ;;  %v1496_v43 = vsel %vm385_vm3, %v1441_v30, -inf }
0x1133   :  { %1497 = vmax.xlane.f32.xlu0 %v1496_v43  ;;  %v1493_v44 = vpop.f32.mrb[38].mxu0 }
0x1134   :  { %v2399_v45 = vpop.f32.mrb[39].mxu0  ;;  %v1499_v46 = vsel %vm385_vm3, %v1491_v38, -inf }
0x1135   :  { %1500 = vmax.xlane.f32.xlu1 %v1499_v46  ;;  %v2506_v45 = vld [vmem:[%s3130_s19 + $0x8] sm:$0xff]  }
0x1146   :  { %1568 = vrot.lane.b32.xlu1 %v2974_v36, %s2634_s17 }
0x11c0   :  { %v1498_v47 = vpop.xlane.xlu0 %1497 }
0x11c1   :  { %v1502_v58 = vsub.f32 %v1441_v30, %v1498_v47 }
0x11c2   :  { %v1501_v48 = vpop.xlane.xlu1 %1500 }
0x11c3   :  { %v1504_v49 = vmul.f32 1.442695, %v1502_v58  ;;  %v1503_v50 = vsub.f32 %v1491_v38, %v1501_v48 }
0x11c5   :  { %2553 = vpow2.f32 %v1504_v49  ;;  %v1506_v59 = vmul.f32 1.442695, %v1503_v50 }
0x11c6   :  { %v1569_v51 = vpop.permute.xlu1 %1568 }
0x11c7   :  { %2555 = vpow2.f32 %v1506_v59  ;;  %v1574_v52 = vsel %vm415_vm4, %v1569_v51, 0  ;;  %v2181_v51 = vld [vmem:[%s3131_s24] ss:$0 sm:$0xff] }
0x11c8   :  { %2407 = vmatpush3.bf16.msra.mxu0 %v1574_v52 }
0x11c9   :  { %2418 = vmatprep.subr.bf16.mxu0 %v2627_v15 }
0x11cf   :  { %v2554_v53 = vpop.eup %2553 }
0x11d0   :  { %v1508_v54 = vsel %vm385_vm3, %v2554_v53, 0.0 }
0x11d1   :  { %v2556_v55 = vpop.eup %2555  ;;  %1509 = vadd.xlane.f32.xlu0 %v1508_v54 }
0x11d2   :  { %v1511_v36 = vsel %vm385_vm3, %v2556_v55, 0.0 }
0x11d5   :  { %1512 = vadd.xlane.f32.xlu0 %v1511_v36  ;;  %v2182_v36 = vld [vmem:[%s3132_s30] ss:$0 sm:$0xff] }
0x11eb   :  { %1520 = vrot.lane.b32.xlu0 %v2972_v33, %s2634_s17 }
0x125e   :  { %v1510_v56 = vpop.xlane.xlu0 %1509 }
0x125f   :  { %2557 = vrcp.f32 %v1510_v56 }
0x1262   :  { %v1513_v57 = vpop.xlane.xlu0 %1512 }
0x1263   :  { %2559 = vrcp.f32 %v1513_v57 }
0x1266   :  { %v1521_v60 = vpop.permute.xlu0 %1520 }
0x1267   :  { %v1526_v61 = vsel %vm415_vm4, %v1521_v60, 0 }
0x1268   :  { %2401 = vmatpush3.bf16.msra.mxu1 %v1526_v61 }
0x1269   :  { %v2558_v62 = vpop.eup %2557  ;;  %2412 = vmatprep.subr.bf16.mxu1 %v2627_v15 }
0x126a   :  { %v1516_v31 = vmul.f32 %v2558_v62, %v2554_v53  ;;  %v2507_v62 = vld [vmem:[%s3133_s6] sm:$0xff]  }
0x126c   :  { %v1518_v63 = vpack.c.bf16 %v1516_v31, %v1516_v31  ;;  %v2508_v31 = vld [vmem:[%s3133_s6 + $0x8] sm:$0xff]  }
0x126d   :  { %v2560_v32 = vpop.eup %2559 }
0x126e   :  { %v1517_v0 = vmul.f32 %v2560_v32, %v2556_v55  ;;  %2403 = vmatmul.mubr.msk.bf16.vlgmr.msra.gmra.mrb[40].mxu1 %vm385_vm3, %v1518_v63  ;;  %v2509_v63 = vld [vmem:[%s3133_s6 + $0x10] sm:$0xff]   ;;  %v2510_v32 = vld [vmem:[%s3133_s6 + $0x18] sm:$0xff]  }
0x126f   :  { %2414 = vmatprep.mubr.msk.bf16.mxu1 %vm2628_vm1, %v2627_v15  ;;  %2413 = vmatpush3.bf16.msra.mxu1 %v2504_v2 }
0x1270   :  { %v1519_v33 = vpack.c.bf16 %v1517_v0, %v1517_v0  ;;  %2424 = vmatprep.subr.bf16.mxu1 %v2627_v15  ;;  %v2183_v0 = vld [vmem:[%s3134_s15] ss:$0 sm:$0xff] }
0x1272   :  { %2409 = vmatmul.mubr.msk.bf16.vlgmr.msra.gmra.mrb[40].mxu0 %vm385_vm3, %v1519_v33 }
0x1273   :  { %2419 = vmatpush3.bf16.msra.mxu0 %v2503_v1  ;;  %2420 = vmatprep.mubr.msk.bf16.mxu0 %vm2628_vm1, %v2627_v15 }
0x1274   :  { %2432 = vmatprep.subr.bf16.mxu0 %v2627_v15 }
0x127a   :  { %2421 = vmatmul.mubr.msk.bf16.vlgmr.msra.gmra.mrb[44].mxu0 %vm290_vm2, %v1395_v22 }
0x127b   :  { %2440 = vmatprep.mubr.msk.bf16.mxu0 %vm2628_vm1, %v2627_v15  ;;  %2433 = vmatpush3.bf16.msra.mxu0 %v2507_v62  ;;  %v2194_v62 = vld [vmem:[%s2779_s20] ss:$0 sm:$0xff]  ;;  %s2635_s20 = smov [#allocation2]  }
0x127c   :  { %2434 = vmatprep.subr.bf16.mxu0 %v2627_v15 }
0x127f   :  { %2435 = vmatpush3.bf16.msra.mxu0 %v2508_v31 }
0x1280   :  { %2436 = vmatprep.subr.bf16.mxu0 %v2627_v15 }
0x1283   :  { %2437 = vmatpush3.bf16.msra.mxu0 %v2509_v63 }
0x1284   :  { %2438 = vmatprep.subr.bf16.mxu0 %v2627_v15 }
0x1287   :  { %2439 = vmatpush3.bf16.msra.mxu0 %v2510_v32 }
0x1341   :  { %v1562_v3 = vpop.f32.mrb[40].mxu1 }
0x1342   :  { %v2404_v4 = vpop.f32.mrb[41].mxu1 }
0x1343   :  { %v1565_v5 = vpop.f32.mrb[42].mxu1 }
0x1344   :  { %v2405_v6 = vpop.f32.mrb[43].mxu1 }
0x1345   :  { %v1610_v7 = vpop.f32.mrb[40].mxu0 }
0x1346   :  { %v1616_v8 = vpack.c.bf16 %v1610_v7, %v1562_v3  ;;  %v2410_v9 = vpop.f32.mrb[41].mxu0 }
0x1347   :  { %v1613_v10 = vpop.f32.mrb[42].mxu0 }
0x1348   :  { %v2411_v42 = vpop.f32.mrb[43].mxu0  ;;  %2415 = vmatmul.mubr.msk.bf16.vlgmr.msra.gmra.mrb[44].mxu1 %vm290_vm2, %v1616_v8 }
0x1349   :  { %2428 = vmatprep.mubr.msk.bf16.mxu1 %vm2628_vm1, %v2627_v15 }
0x134d   :  { %v1710_v11 = vpop.f32.mrb[44].mxu0 }
0x134e   :  { %v2422_v12 = vpop.f32.mrb[45].mxu0 }
0x134f   :  { %v1713_v13 = vpop.f32.mrb[46].mxu0 }
0x1350   :  { %v2423_v14 = vpop.f32.mrb[47].mxu0 }
0x141b   :  { %v1660_v16 = vpop.f32.mrb[44].mxu1 }
0x141c   :  { %v1711_v18 = vadd.f32 %v1710_v11, %v1660_v16  ;;  %v2416_v19 = vpop.f32.mrb[45].mxu1 }
0x141d   :  { %v1663_v20 = vpop.f32.mrb[46].mxu1 }
0x141e   :  { %v1724_v21 = vadd.f32 %v2180_v17, %v1711_v18  ;;  %v1714_v39 = vadd.f32 %v1713_v13, %v1663_v20  ;;  %v2417_v22 = vpop.f32.mrb[47].mxu1 }
0x1420   :  { %v1725_v25 = vadd.f32 %v2180_v17, %v1714_v39  ;;  %v1726_v26 = vadd.f32 %v1724_v21, %v2962_v23 }
0x1422   :  { %v1730_v27 = vsel %vm132_vm0, %v1726_v26, 0.0  ;;  %v1727_v28 = vadd.f32 %v1725_v25, %v2964_v24  ;;  %v2505_v24 = vld [vmem:[%s3130_s19] sm:$0xff]  }
0x1423   :  { %1731 = vadd.xlane.f32.xlu1 %v1730_v27  ;;  %2425 = vmatpush3.bf16.msra.mxu1 %v2505_v24 }
0x1424   :  { %v1733_v29 = vsel %vm132_vm0, %v1727_v28, 0.0  ;;  %2426 = vmatprep.subr.bf16.mxu1 %v2627_v15 }
0x1425   :  { %1734 = vadd.xlane.f32.xlu0 %v1733_v29 }
0x1427   :  { %2427 = vmatpush3.bf16.msra.mxu1 %v2506_v45 }
0x1428   :  { %2444 = vmatprep.subr.bf16.mxu1 %v2627_v15 }
0x14b0   :  { %v1732_v30 = vpop.xlane.xlu1 %1731 }
0x14b1   :  { %v1736_v34 = vmul.f32 0.03125, %v1732_v30 }
0x14b2   :  { %v1735_v35 = vpop.xlane.xlu0 %1734 }
0x14b3   :  { %v1738_v37 = vsub.f32 %v1726_v26, %v1736_v34  ;;  %v1737_v38 = vmul.f32 0.03125, %v1735_v35  ;;  %v2187_v26 = vld [vmem:[%s3135_s16] ss:$0 sm:$0xff] }
0x14b5   :  { %v1739_v40 = vsub.f32 %v1727_v28, %v1737_v38  ;;  %v1740_v41 = vmul.f32 %v1738_v37, %v1738_v37 }
0x14b7   :  { %v1742_v43 = vsel %vm132_vm0, %v1740_v41, 0.0  ;;  %v1741_v23 = vmul.f32 %v1739_v40, %v1739_v40 }
0x14b8   :  { %1743 = vadd.xlane.f32.xlu0 %v1742_v43 }
0x14b9   :  { %v1745_v44 = vsel %vm132_vm0, %v1741_v23, 0.0 }
0x14ba   :  { %1746 = vadd.xlane.f32.xlu1 %v1745_v44 }
0x1545   :  { %v1744_v46 = vpop.xlane.xlu0 %1743 }
0x1546   :  { %v1748_v47 = vmul.f32 0.03125, %v1744_v46 }
0x1547   :  { %v1747_v58 = vpop.xlane.xlu1 %1746 }
0x1548   :  { %v1750_v48 = vadd.f32 1e-12, %v1748_v47  ;;  %v1749_v49 = vmul.f32 0.03125, %v1747_v58 }
0x154a   :  { %2561 = vrsqrt.f32 %v1750_v48  ;;  %v1751_v50 = vadd.f32 1e-12, %v1749_v49 }
0x154c   :  { %2563 = vrsqrt.f32 %v1751_v50  ;;  %v2511_v50 = vld [vmem:[%s2784_s27] sm:$0xff]  }
0x1554   :  { %v2562_v59 = vpop.eup %2561 }
0x1555   :  { %v1754_v52 = vmul.f32 %v2562_v59, %v1738_v37  ;;  %v2512_v59 = vld [vmem:[%s2784_s27 + $0x8] sm:$0xff]   ;;  %s2088_s27 = sshll.u32 %s2635_s20, 4  ;;  %s2089_s27 = int_to_ptr.vmem [resolvable:$true] %s2088_s27 }
0x1556   :  { %v2564_v53 = vpop.eup %2563  ;;  %s2573_s22 = scalar_lea.vmem %s2089_s27, 32  ;;  %p2578_p1 = scmp.lt.s32.totalorder %s2089_s27, %s2089_s27 }
0x1557   :  { %v1762_v54 = vmul.f32 %v2181_v51, %v1754_v52  ;;  %v1755_v55 = vmul.f32 %v2564_v53, %v1739_v40  ;;  %p2574_p0 = scmp.ne.s32.totalorder %s2089_s27, %s2573_s22  ;;  %p2579_p2 = scmp.lt.s32.totalorder %s2573_s22, %s2573_s22 }
0x1559   :  { %v1763_v56 = vmul.f32 %v2181_v51, %v1755_v55  ;;  %v1770_v57 = vadd.f32 %v2182_v36, %v1762_v54  ;;  %p2580_p3 = por %p2579_p2, %p2578_p1 }
0x155b   :  { %v1771_v60 = vadd.f32 %v2182_v36, %v1763_v56  ;;  %p2581_p4 = pnand %p2580_p3, %p2574_p0 }
0x155d   :  { %v1776_v61 = vpack.c.bf16 %v1771_v60, %v1770_v57 }
0x155f   :  { %2429 = vmatmul.mubr.msk.bf16.vlgmr.msra.gmra.mrb[48].mxu1 %vm132_vm0, %v1776_v61 }
0x1560   :  { %2448 = vmatprep.mubr.msk.bf16.mxu1 %vm2628_vm1, %v2627_v15  ;;  %2445 = vmatpush3.bf16.msra.mxu1 %v2511_v50 }
0x1561   :  { %2446 = vmatprep.subr.bf16.mxu1 %v2627_v15 }
0x1564   :  { %2447 = vmatpush3.bf16.msra.mxu1 %v2512_v59 }
0x1632   :  { %v1833_v1 = vpop.f32.mrb[48].mxu1 }
0x1633   :  { %v1834_v33 = vadd.f32 %v2183_v0, %v1833_v1  ;;  %v2430_v2 = vpop.f32.mrb[49].mxu1 }
0x1634   :  { %v1836_v3 = vpop.f32.mrb[50].mxu1 }
0x1635   :  { %v1840_v4 = vmul.f32 %v1834_v33, %v1834_v33  ;;  %v1837_v5 = vadd.f32 %v2183_v0, %v1836_v3  ;;  %v2431_v6 = vpop.f32.mrb[51].mxu1 }
0x1637   :  { %v1842_v7 = vmul.f32 %v1840_v4, %v1834_v33  ;;  %v1841_v8 = vmul.f32 %v1837_v5, %v1837_v5 }
0x1639   :  { %v1844_v9 = vmul.f32 0.044715, %v1842_v7  ;;  %v1843_v10 = vmul.f32 %v1841_v8, %v1837_v5 }
0x163b   :  { %v1846_v42 = vadd.f32 %v1844_v9, %v1834_v33  ;;  %v1845_v11 = vmul.f32 0.044715, %v1843_v10 }
0x163d   :  { %v1848_v12 = vmul.f32 0.7978846, %v1846_v42  ;;  %v1847_v13 = vadd.f32 %v1845_v11, %v1837_v5 }
0x163f   :  { %2565 = vtanh.f32 %v1848_v12  ;;  %v1849_v14 = vmul.f32 0.7978846, %v1847_v13 }
0x1641   :  { %2567 = vtanh.f32 %v1849_v14 }
0x1649   :  { %v2566_v16 = vpop.eup %2565 }
0x164a   :  { %v1852_v17 = vadd.f32 1.0, %v2566_v16 }
0x164b   :  { %v2568_v18 = vpop.eup %2567 }
0x164c   :  { %v1854_v19 = vmul.f32 0.5, %v1852_v17  ;;  %v1853_v20 = vadd.f32 1.0, %v2568_v18 }
0x164e   :  { %v1855_v21 = vmul.f32 0.5, %v1853_v20  ;;  %v1856_v39 = vmul.f32 %v1854_v19, %v1834_v33 }
0x1650   :  { %v1857_v22 = vmul.f32 %v1855_v21, %v1837_v5 }
0x1652   :  { %v1866_v25 = vpack.c.bf16 %v1857_v22, %v1856_v39  ;;  %v2195_v39 = vld [vmem:[%s2789_s4] ss:$0 sm:$0xff] }
0x1654   :  { %2441 = vmatmul.mubr.msk.bf16.vlgmr.msra.gmra.mrb[48].mxu0 %vm1010_vm5, %v1866_v25 }
0x1727   :  { %v1935_v27 = vpop.f32.mrb[48].mxu0 }
0x1728   :  { %v1936_v28 = vadd.f32 %v2187_v26, %v1935_v27  ;;  %v2442_v29 = vpop.f32.mrb[49].mxu0 }
0x1729   :  { %v1938_v30 = vpop.f32.mrb[50].mxu0 }
0x172a   :  { %v1939_v34 = vadd.f32 %v2187_v26, %v1938_v30  ;;  %v2443_v35 = vpop.f32.mrb[51].mxu0  ;;  %v1942_v37 = vadd.f32 %v1936_v28, %v1770_v57  ;;  %v2193_v57 = vld [vmem:[%s3136_s18] ss:$0 sm:$0xff] }
0x172c   :  { %v1946_v38 = vsel %vm132_vm0, %v1942_v37, 0.0  ;;  %v1943_v40 = vadd.f32 %v1939_v34, %v1771_v60 }
0x172d   :  { %1947 = vadd.xlane.f32.xlu0 %v1946_v38 }
0x172e   :  { %v1949_v41 = vsel %vm132_vm0, %v1943_v40, 0.0 }
0x172f   :  { %1950 = vadd.xlane.f32.xlu1 %v1949_v41 }
0x17ba   :  { %v1948_v43 = vpop.xlane.xlu0 %1947 }
0x17bb   :  { %v1952_v23 = vmul.f32 0.03125, %v1948_v43 }
0x17bc   :  { %v1951_v44 = vpop.xlane.xlu1 %1950 }
0x17bd   :  { %v1954_v24 = vsub.f32 %v1942_v37, %v1952_v23  ;;  %v1953_v45 = vmul.f32 0.03125, %v1951_v44 }
0x17bf   :  { %v1955_v46 = vsub.f32 %v1943_v40, %v1953_v45  ;;  %v1956_v47 = vmul.f32 %v1954_v24, %v1954_v24 }
0x17c1   :  { %v1958_v58 = vsel %vm132_vm0, %v1956_v47, 0.0  ;;  %v1957_v48 = vmul.f32 %v1955_v46, %v1955_v46 }
0x17c2   :  { %1959 = vadd.xlane.f32.xlu0 %v1958_v58 }
0x17c3   :  { %v1961_v49 = vsel %vm132_vm0, %v1957_v48, 0.0 }
0x17c4   :  { %1962 = vadd.xlane.f32.xlu1 %v1961_v49 }
0x184f   :  { %v1960_v51 = vpop.xlane.xlu0 %1959 }
0x1850   :  { %v1964_v52 = vmul.f32 0.03125, %v1960_v51 }
0x1851   :  { %v1963_v53 = vpop.xlane.xlu1 %1962 }
0x1852   :  { %v1966_v54 = vadd.f32 1e-12, %v1964_v52  ;;  %v1965_v55 = vmul.f32 0.03125, %v1963_v53 }
0x1854   :  { %2569 = vrsqrt.f32 %v1966_v54  ;;  %v1967_v36 = vadd.f32 1e-12, %v1965_v55 }
0x1856   :  { %2571 = vrsqrt.f32 %v1967_v36 }
0x185e   :  { %v2570_v56 = vpop.eup %2569 }
0x185f   :  { %v1970_v60 = vmul.f32 %v2570_v56, %v1954_v24 }
0x1860   :  { %v2572_v61 = vpop.eup %2571 }
0x1861   :  { %v1978_v31 = vmul.f32 %v2193_v57, %v1970_v60  ;;  %v1971_v63 = vmul.f32 %v2572_v61, %v1955_v46 }
0x1863   :  { %v1986_v32 = vadd.f32 %v2194_v62, %v1978_v31  ;;  %v1979_v0 = vmul.f32 %v2193_v57, %v1971_v63 }
0x1865   :  { %v1988_v15 = vsel %vm132_vm0, %v1986_v32, 0.0  ;;  %v1987_v1 = vadd.f32 %v2194_v62, %v1979_v0 }
0x1866   :  { %v1989_v33 = vrot.slane %v1988_v15, 4 }
0x1867   :  { %v1995_v2 = vsel %vm132_vm0, %v1987_v1, 0.0 }
0x1868   :  { %v1990_v3 = vadd.f32 %v1989_v33, %v1988_v15  ;;  %v1996_v4 = vrot.slane %v1995_v2, 4 }
0x186a   :  { %v1991_v5 = vrot.slane %v1990_v3, 2  ;;  %v1997_v6 = vadd.f32 %v1996_v4, %v1995_v2 }
0x186c   :  { %v1998_v7 = vrot.slane %v1997_v6, 2  ;;  %v1992_v8 = vadd.f32 %v1991_v5, %v1990_v3 }
0x186e   :  { %v1993_v9 = vrot.slane %v1992_v8, 1  ;;  %v1999_v10 = vadd.f32 %v1998_v7, %v1997_v6 }
0x1870   :  { %v1994_v42 = vadd.f32 %v1993_v9, %v1992_v8  ;;  %v2000_v11 = vrot.slane %v1999_v10, 1 }
0x1872   :  { %v2001_v12 = vadd.f32 %v2000_v11, %v1999_v10  ;;  %v2003_v13 = vmul.f32 0.125, %v1994_v42 }
0x1874   :  { %v2004_v14 = vmul.f32 0.125, %v2001_v12  ;;  %v2009_v16 = vpack.c.bf16 %v2003_v13, %v2003_v13 }
0x1876   :  { %v2010_v17 = vpack.c.bf16 %v2004_v14, %v2004_v14  ;;  %v2020_v18 = vunpack.c.l.b16 %v2009_v16 }
0x1878   :  { %v2021_v19 = vunpack.c.l.b16 %v2010_v17 }
0x187a   :  { %v2023_v20 = vsel %vm2022_vm6, %v2021_v19, %v2020_v18 }
0x187b   :  { %v2024_v21 = vpack.c.b16 %v2023_v20, %v2023_v20 }
0x187d   :  { %2449 = vmatmul.mubr.msk.bf16.vlgmr.msra.gmra.mrb[52].mxu1 %vm132_vm0, %v2024_v21 }
0x1950   :  { %v2074_v22 = vpop.f32.mrb[52].mxu1 }
0x1951   :  { %v2075_v25 = vadd.f32 %v2195_v39, %v2074_v22  ;;  %v2450_v26 = vpop.f32.mrb[53].mxu1 }
0x1952   :  { %v2077_v27 = vpop.f32.mrb[54].mxu1 }
0x1953   :  { %v2451_v28 = vpop.f32.mrb[55].mxu1  ;;  %2081 = vst.msk [vmem:[#allocation2] sm:$0x3] %vm2080_vm7, %v2075_v25 }
0x1954   :  { %2584 = shalt.err (!%p2581_p4)
}
0x1955   :  { %s2585_s4 = scalar_lea.hbm %s2794_s12, 32 }
0x1956   :  { %p2586_p5 = scmp.ne.s32.totalorder %s2794_s12, %s2585_s4  ;;  %p2589_p6 = scmp.lt.u32.totalorder %s2585_s4, %s2794_s12 }
0x1958   :  { %p2591_p7 = pnand %p2589_p6, %p2586_p5 }
0x195a   :  { %2594 = shalt.err (!%p2591_p7)
}
0x195b   :  { %2091 = dma.vmem_to_hbm [thread:$0]  %s2089_s27, 32, %s2794_s12, [#allocation3]  }
0x195c   :  { %2595 = dma.done.wait [#allocation3], 32  }
0x195d   :  { %2596 = vsyncadd [#allocation3], 4294967264 }
0x195e   :  { %2095 = vsyncpa [#allocation3], 1 }

</bundles_post_ra>
